<compile_context>
chip_gen: v6e
topology: v6e:2x2x1
jax: 0.10.0
libtpu: 0.0.40
codegen_flags: <defaults>
</compile_context>

<pallas_src>
import jax
import jax.numpy as jnp
from jax.experimental import pallas as pl
from jax.experimental.pallas import tpu as pltpu

IN_F = 1 * 28 * 28      # 784
IN_F_PAD = 896          # 7 * 128 — lane-aligned contraction dim for the first GEMM
H1 = 512
H2 = 256
OUT_F = 10
OUT_F_PAD = 128         # lane-dense output block


def _round_up(n, m):
    return ((n + m - 1) // m) * m


def mlp_kernel(x_ref, w1_ref, b1_ref, w2_ref, b2_ref, w3_ref, b3_ref, o_ref):
    # Three MXU matmuls (bf16 in, f32 accumulate) + bias + ReLU, all in VMEM.
    x = x_ref[...]                                                     # (bm, 896) bf16
    h1 = jnp.dot(x, w1_ref[...], preferred_element_type=jnp.float32) + b1_ref[...]
    h1 = jnp.maximum(h1, 0.0).astype(jnp.bfloat16)                     # (bm, 512)
    h2 = jnp.dot(h1, w2_ref[...], preferred_element_type=jnp.float32) + b2_ref[...]
    h2 = jnp.maximum(h2, 0.0).astype(jnp.bfloat16)                     # (bm, 256)
    h3 = jnp.dot(h2, w3_ref[...], preferred_element_type=jnp.float32) + b3_ref[...]
    o_ref[...] = jnp.maximum(h3, 0.0).astype(o_ref.dtype)              # (bm, 128) lane-dense


def mlp_forward(x_nchw, params, *, bm=1024):
    """x_nchw: (B, 1, 28, 28) f32 (PyTorch NCHW layout). Returns (B, 10) f32."""
    w1, b1, w2, b2, w3, b3 = params
    B = x_nchw.shape[0]

    # flatten(1), pad features 784 -> 896, cast to bf16 (MXU-native, halves input DMA)
    x = x_nchw.reshape(B, -1).astype(jnp.bfloat16)
    x = jnp.pad(x, ((0, 0), (0, IN_F_PAD - IN_F)))

    # clamp the batch tile to the (sublane-padded) batch, then pad batch to a tile multiple
    bm = min(bm, _round_up(B, 8))
    B_pad = _round_up(B, bm)
    if B_pad != B:
        x = jnp.pad(x, ((0, B_pad - B), (0, 0)))

    # weight prep: pad w1 contraction rows to 896, pad layer-3 outputs to 128 lanes
    w1p = jnp.pad(w1, ((0, IN_F_PAD - IN_F), (0, 0))).astype(jnp.bfloat16)
    w2p = w2.astype(jnp.bfloat16)
    w3p = jnp.pad(w3, ((0, 0), (0, OUT_F_PAD - OUT_F))).astype(jnp.bfloat16)
    b1p = b1.astype(jnp.float32)
    b2p = b2.astype(jnp.float32)
    b3p = jnp.pad(b3, ((0, 0), (0, OUT_F_PAD - OUT_F))).astype(jnp.float32)

    grid = (B_pad // bm,)
    const = lambda i: (0, 0)   # weights / biases: single VMEM-resident block across the grid

    flops = 2 * B_pad * (IN_F_PAD * H1 + H1 * H2 + H2 * OUT_F_PAD)
    bytes_accessed = (
        x.size * 2                                   # bf16 input stream
        + (w1p.size + w2p.size + w3p.size) * 2       # bf16 weights (once)
        + (b1p.size + b2p.size + b3p.size) * 4       # f32 biases (once)
        + B_pad * OUT_F_PAD * 4                      # f32 output stream
    )

    out = pl.pallas_call(
        mlp_kernel,
        out_shape=jax.ShapeDtypeStruct((B_pad, OUT_F_PAD), jnp.float32),
        grid=grid,
        in_specs=[
            pl.BlockSpec((bm, IN_F_PAD), lambda i: (i, 0)),
            pl.BlockSpec((IN_F_PAD, H1), const),
            pl.BlockSpec((1, H1), const),
            pl.BlockSpec((H1, H2), const),
            pl.BlockSpec((1, H2), const),
            pl.BlockSpec((H2, OUT_F_PAD), const),
            pl.BlockSpec((1, OUT_F_PAD), const),
        ],
        out_specs=pl.BlockSpec((bm, OUT_F_PAD), lambda i: (i, 0)),
        compiler_params=pltpu.CompilerParams(
            dimension_semantics=("parallel",),
        ),
        cost_estimate=pl.CostEstimate(
            flops=flops, transcendentals=0, bytes_accessed=bytes_accessed),
    )(x, w1p, b1p, w2p, b2p, w3p, b3p)

    # strip batch padding and the lane padding of the final layer
    return out[:B, :OUT_F]


def init_params(key):
    # Deterministic init mirroring nn.Linear's uniform(-1/sqrt(fan_in), 1/sqrt(fan_in)).
    dims = [(IN_F, H1), (H1, H2), (H2, OUT_F)]
    params = []
    for fan_in, fan_out in dims:
        kw, kb, key = jax.random.split(key, 3)
        bound = 1.0 / (fan_in ** 0.5)
        w = jax.random.uniform(kw, (fan_in, fan_out), jnp.float32, -bound, bound)
        b = jax.random.uniform(kb, (1, fan_out), jnp.float32, -bound, bound)
        params += [w, b]
    return params


if __name__ == "__main__":
    key = jax.random.PRNGKey(0)
    kx, kp = jax.random.split(key)
    B = 24                                        # small batch; not a multiple of the tile
    x = jax.random.normal(kx, (B, 1, 28, 28), jnp.float32)  # NCHW, like PyTorch
    params = init_params(kp)

    # bm=16 so the small test exercises the batch grid (2 steps) and batch padding (24 -> 32)
    out = mlp_forward(x, params, bm=16)
    jax.block_until_ready(out)

    # reference: same bf16-input / f32-accumulate math in plain JAX
    w1, b1, w2, b2, w3, b3 = params
    xf = x.reshape(B, -1)

    def ref_layer(h, w, b):
        y = jnp.dot(h.astype(jnp.bfloat16), w.astype(jnp.bfloat16),
                    preferred_element_type=jnp.float32) + b
        return jnp.maximum(y, 0.0)

    ref = ref_layer(xf, w1, b1)
    ref = ref_layer(ref, w2, b2)
    ref = ref_layer(ref, w3, b3)

    assert out.shape == (B, 10)
    assert jnp.allclose(out, ref, atol=1e-2, rtol=1e-2), float(jnp.max(jnp.abs(out - ref)))

    print("KERNEL_OK")
</pallas_src>

<mosaic_0001>
module attributes {stable_mosaic.version = 11 : i64} {
  func.func @mlp_kernel(%arg0: i32, %arg1: memref<16x896xbf16, #tpu.memory_space<vmem>>, %arg2: memref<896x512xbf16, #tpu.memory_space<vmem>>, %arg3: memref<1x512xf32, #tpu.memory_space<vmem>>, %arg4: memref<512x256xbf16, #tpu.memory_space<vmem>>, %arg5: memref<1x256xf32, #tpu.memory_space<vmem>>, %arg6: memref<256x128xbf16, #tpu.memory_space<vmem>>, %arg7: memref<1x128xf32, #tpu.memory_space<vmem>>, %arg8: memref<16x128xf32, #tpu.memory_space<vmem>>) attributes {dimension_semantics = [#tpu.dimension_semantics<parallel>], iteration_bounds = array<i64: 2>, scalar_prefetch = 0 : i64, scratch_operands = 0 : i64, tpu.core_type = #tpu.core_type<tc>, window_params = [{transform_indices = @transform_0, window_bounds = array<i64: 16, 896>}, {pipeline_mode = #tpu.pipeline_mode<synchronous>, transform_indices = @transform_1, window_bounds = array<i64: 896, 512>}, {pipeline_mode = #tpu.pipeline_mode<synchronous>, transform_indices = @transform_2, window_bounds = array<i64: 1, 512>}, {pipeline_mode = #tpu.pipeline_mode<synchronous>, transform_indices = @transform_3, window_bounds = array<i64: 512, 256>}, {pipeline_mode = #tpu.pipeline_mode<synchronous>, transform_indices = @transform_4, window_bounds = array<i64: 1, 256>}, {pipeline_mode = #tpu.pipeline_mode<synchronous>, transform_indices = @transform_5, window_bounds = array<i64: 256, 128>}, {pipeline_mode = #tpu.pipeline_mode<synchronous>, transform_indices = @transform_6, window_bounds = array<i64: 1, 128>}, {transform_indices = @transform_7, window_bounds = array<i64: 16, 128>}]} {
    %c0 = arith.constant 0 : index
    %c0_0 = arith.constant 0 : index
    %0 = vector.load %arg1[%c0, %c0_0] : memref<16x896xbf16, #tpu.memory_space<vmem>>, vector<16x896xbf16>
    %c0_1 = arith.constant 0 : index
    %c0_2 = arith.constant 0 : index
    %1 = vector.load %arg2[%c0_1, %c0_2] : memref<896x512xbf16, #tpu.memory_space<vmem>>, vector<896x512xbf16>
    %cst = arith.constant dense<0.000000e+00> : vector<16x512xf32>
    %2 = tpu.matmul %0, %1, %cst {dimension_numbers = #tpu.dot_dimension_numbers<[1], [0], [0], [1], [0, 0, 1, 1], [], []>} : vector<16x896xbf16>, vector<896x512xbf16>, vector<16x512xf32> -> vector<16x512xf32>
    %c0_3 = arith.constant 0 : index
    %c0_4 = arith.constant 0 : index
    %3 = vector.load %arg3[%c0_3, %c0_4] : memref<1x512xf32, #tpu.memory_space<vmem>>, vector<1x512xf32>
    %4 = vector.broadcast %3 : vector<1x512xf32> to vector<16x512xf32>
    %5 = arith.addf %2, %4 : vector<16x512xf32>
    %cst_5 = arith.constant 0.000000e+00 : f32
    %6 = vector.broadcast %cst_5 : f32 to vector<16x512xf32>
    %7 = arith.maximumf %5, %6 : vector<16x512xf32>
    %8 = arith.truncf %7 : vector<16x512xf32> to vector<16x512xbf16>
    %c0_6 = arith.constant 0 : index
    %c0_7 = arith.constant 0 : index
    %9 = vector.load %arg4[%c0_6, %c0_7] : memref<512x256xbf16, #tpu.memory_space<vmem>>, vector<512x256xbf16>
    %cst_8 = arith.constant dense<0.000000e+00> : vector<16x256xf32>
    %10 = tpu.matmul %8, %9, %cst_8 {dimension_numbers = #tpu.dot_dimension_numbers<[1], [0], [0], [1], [0, 0, 1, 1], [], []>} : vector<16x512xbf16>, vector<512x256xbf16>, vector<16x256xf32> -> vector<16x256xf32>
    %c0_9 = arith.constant 0 : index
    %c0_10 = arith.constant 0 : index
    %11 = vector.load %arg5[%c0_9, %c0_10] : memref<1x256xf32, #tpu.memory_space<vmem>>, vector<1x256xf32>
    %12 = vector.broadcast %11 : vector<1x256xf32> to vector<16x256xf32>
    %13 = arith.addf %10, %12 : vector<16x256xf32>
    %cst_11 = arith.constant 0.000000e+00 : f32
    %14 = vector.broadcast %cst_11 : f32 to vector<16x256xf32>
    %15 = arith.maximumf %13, %14 : vector<16x256xf32>
    %16 = arith.truncf %15 : vector<16x256xf32> to vector<16x256xbf16>
    %c0_12 = arith.constant 0 : index
    %c0_13 = arith.constant 0 : index
    %17 = vector.load %arg6[%c0_12, %c0_13] : memref<256x128xbf16, #tpu.memory_space<vmem>>, vector<256x128xbf16>
    %cst_14 = arith.constant dense<0.000000e+00> : vector<16x128xf32>
    %18 = tpu.matmul %16, %17, %cst_14 {dimension_numbers = #tpu.dot_dimension_numbers<[1], [0], [0], [1], [0, 0, 1, 1], [], []>} : vector<16x256xbf16>, vector<256x128xbf16>, vector<16x128xf32> -> vector<16x128xf32>
    %c0_15 = arith.constant 0 : index
    %c0_16 = arith.constant 0 : index
    %19 = vector.load %arg7[%c0_15, %c0_16] : memref<1x128xf32, #tpu.memory_space<vmem>>, vector<1x128xf32>
    %20 = vector.broadcast %19 : vector<1x128xf32> to vector<16x128xf32>
    %21 = arith.addf %18, %20 : vector<16x128xf32>
    %cst_17 = arith.constant 0.000000e+00 : f32
    %22 = vector.broadcast %cst_17 : f32 to vector<16x128xf32>
    %23 = arith.maximumf %21, %22 : vector<16x128xf32>
    %c0_18 = arith.constant 0 : index
    %c0_19 = arith.constant 0 : index
    %24 = vector.load %arg8[%c0_18, %c0_19] : memref<16x128xf32, #tpu.memory_space<vmem>>, vector<16x128xf32>
    tpu.vector_store %arg8[%c0_18, %c0_19], %23 {strides = array<i32>} : memref<16x128xf32, #tpu.memory_space<vmem>>, vector<16x128xf32>,
    return
  }
  func.func @transform_0(%arg0: i32) -> (i32, i32) {
    %c0_i32 = arith.constant 0 : i32
    %c0_i32_0 = arith.constant 0 : i32
    return %arg0, %c0_i32 : i32, i32
  }
  func.func @transform_1(%arg0: i32) -> (i32, i32) {
    %c0_i32 = arith.constant 0 : i32
    %c0_i32_0 = arith.constant 0 : i32
    %c0_i32_1 = arith.constant 0 : i32
    return %c0_i32, %c0_i32_0 : i32, i32
  }
  func.func @transform_2(%arg0: i32) -> (i32, i32) {
    %c0_i32 = arith.constant 0 : i32
    %c0_i32_0 = arith.constant 0 : i32
    %c0_i32_1 = arith.constant 0 : i32
    return %c0_i32, %c0_i32_0 : i32, i32
  }
  func.func @transform_3(%arg0: i32) -> (i32, i32) {
    %c0_i32 = arith.constant 0 : i32
    %c0_i32_0 = arith.constant 0 : i32
    %c0_i32_1 = arith.constant 0 : i32
    return %c0_i32, %c0_i32_0 : i32, i32
  }
  func.func @transform_4(%arg0: i32) -> (i32, i32) {
    %c0_i32 = arith.constant 0 : i32
    %c0_i32_0 = arith.constant 0 : i32
    %c0_i32_1 = arith.constant 0 : i32
    return %c0_i32, %c0_i32_0 : i32, i32
  }
  func.func @transform_5(%arg0: i32) -> (i32, i32) {
    %c0_i32 = arith.constant 0 : i32
    %c0_i32_0 = arith.constant 0 : i32
    %c0_i32_1 = arith.constant 0 : i32
    return %c0_i32, %c0_i32_0 : i32, i32
  }
  func.func @transform_6(%arg0: i32) -> (i32, i32) {
    %c0_i32 = arith.constant 0 : i32
    %c0_i32_0 = arith.constant 0 : i32
    %c0_i32_1 = arith.constant 0 : i32
    return %c0_i32, %c0_i32_0 : i32, i32
  }
  func.func @transform_7(%arg0: i32) -> (i32, i32) {
    %c0_i32 = arith.constant 0 : i32
    %c0_i32_0 = arith.constant 0 : i32
    return %arg0, %c0_i32 : i32, i32
  }
}

</mosaic_0001>

<bundles_post_ra>
// kernel: tpu_custom_call.1
= control target key start
LH: loop header
LB: loop body
LE: loop exit
PB: predicated region body
PF: predicated region fallthrough
CT: control target
= control target key end

     0   :  { %s4360_s0 = inlined_call_operand.hbm [shape: bf16[32,896], index: 0, kind: input, shape index: {}]   ;;  %s4361_s1 = inlined_call_operand.hbm [shape: bf16[896,512], index: 1, kind: input, shape index: {}]   ;;  %s4362_s2 = inlined_call_operand.hbm [shape: f32[1,512], index: 2, kind: input, shape index: {}]   ;;  %s4363_s3 = inlined_call_operand.hbm [shape: bf16[512,256], index: 3, kind: input, shape index: {}]   ;;  %s4364_s4 = inlined_call_operand.vmem [shape: f32[1,256], index: 4, kind: input, shape index: {}]   ;;  %s4365_s5 = inlined_call_operand.hbm [shape: bf16[256,128], index: 5, kind: input, shape index: {}]   ;;  %s4366_s6 = inlined_call_operand.vmem [shape: f32[1,128], index: 6, kind: input, shape index: {}]   ;;  %s4367_s7 = inlined_call_operand.hbm [shape: f32[32,128], index: 7, kind: output, shape index: {}]  }
   0x1   :  { %4372 = sst [smem:[#allocation16_spill]] %s4361_s1 }
   0x2   :  { %12 = vsyncpa [#allocation3], 0 }
   0x3   :  { %14 = vsyncpa [#allocation3 + $0x1], 0 }
   0x4   :  { %15 = vsyncpa [#allocation6], 0 }
   0x5   :  { %16 = vsyncpa [#allocation9], 0 }
   0x6   :  { %17 = vsyncpa [#allocation4], 0 }
   0x7   :  { %19 = vsyncpa [#allocation4 + $0x1], 0  ;;  %s4095_s24 = smov 0   ;;  %s4097_s25 = smov 0  }
   0x8   :  { %s4099_s26 = smov 0   ;;  %s4101_s27 = smov 0  }
   0x9 LB: > { %s4116_s28 = sadd.s32 4294967295, %s4036_s27   ;;  %s2916_s29 = sadd.s32 4294967294, %s4036_s27   ;;  %s4036_s27 = sphi %s4101_s27, %s4393_s27   ;;  %s4032_s26 = sphi %s4099_s26, %s4392_s26   ;;  %s4028_s25 = sphi %s4097_s25, %s4391_s25   ;;  %s4024_s24 = sphi %s4095_s24, %s4390_s24  }
   0xa   : > { %p45_p0 = scmp.ne.s32.totalorder %s4028_s25, %s4024_s24  ;;  %p4368_p1 = scmp.eq.s32.totalorder %s4116_s28, 0 }
   0xb   : > { %p201_p3 = scmp.eq.s32.totalorder %s2916_s29, 1  ;;  %p2917_p5 = scmp.ge.s32.totalorder %s4036_s27, 1 }
   0xc   : > { %p4125_p4 = por %p4368_p1, %p45_p0  ;;  %p208_p7 = scmp.lt.s32.totalorder %s4036_s27, 3 }
   0xd   : > { %p4130_p6 = por %p201_p3, %p45_p0  ;;  %s4038_s10 = smov [#allocation5]  }
   0xe   : > { %s4373_s30 = scalar_select %p4125_p4, 1, 0 }
   0xf   : > { %s4374_s8 = scalar_select %p4130_p6, 1, 0 }
  0x10   : > { %p4135_p8 = pnand %p2917_p5, %p208_p7  ;;  %s220_s11 = sshll.u32 %s4038_s10, 4  ;;  %s221_s11 = int_to_ptr.vmem [resolvable:$true] %s220_s11 }
  0x11   : > { %s4039_s13 = smov [#allocation8]   ;;  %s3843_s15 = scalar_lea.vmem %s221_s11, 28672 }
  0x12   : > { %s4375_s9 = scalar_select %p4135_p8, 1, 0 }
  0x13   : > { %p3295_p9 = pneg %p4135_p8  ;;  %s244_s14 = sshll.u32 %s4039_s13, 4  ;;  %s245_s14 = int_to_ptr.vmem [resolvable:$true] %s244_s14 }
  0x14   : > { %p3844_p13 = scmp.ne.s32.totalorder %s221_s11, %s3843_s15  ;;  %p3851_p5 = scmp.lt.s32.totalorder %s221_s11, %s221_s11 }
  0x15   : > { %p4144_p11 = pnand %p3295_p9, %p4368_p1  ;;  %p3852_p7 = scmp.lt.s32.totalorder %s3843_s15, %s3843_s15 }
  0x17   : > { %p3834_p12 = pneg %p4144_p11  ;;  %p3853_p10 = por %p3852_p7, %p3851_p5 }
  0x19   : > { %p3846_p0 = pnand %p3844_p13, %p3834_p12 }
  0x1b   : > { %p3847_p3 = pneg %p3846_p0 }
  0x1d   : > { %p3854_p9 = pnand %p3853_p10, %p3847_p3 }
  0x1f   : > { %3857 = shalt.err (!%p3854_p9)
}
  0x20   : > { %s4040_s16 = smov 256   ;;  %s4041_s17 = smov 16  }
  0x21   : > { %s4377_s1 = sld [smem:[#allocation16_spill]]  ;;  %s3869_s20 = scalar_lea.vmem %s245_s14, 8192 }
  0x22   : > { %p3870_p1 = scmp.ne.s32.totalorder %s245_s14, %s3869_s20  ;;  %p3877_p2 = scmp.lt.s32.totalorder %s245_s14, %s245_s14 }
  0x23   : > { %p3878_p6 = scmp.lt.s32.totalorder %s3869_s20, %s3869_s20 }
  0x24   : > { %p3872_p13 = pnand %p3870_p1, %p3834_p12 }
  0x25   : > { %p3879_p5 = por %p3878_p6, %p3877_p2 }
  0x26   : > { %p3873_p0 = pneg %p3872_p13 }
  0x27   : > { %3298 = dma.hbm_to_vmem [thread:$0]  (!%p4144_p11), %s4377_s1, 28672, %s221_s11, [#allocation6], %s4040_s16, %s4040_s16, %s4041_s17  }
  0x28   : > { %p3880_p10 = pnand %p3879_p5, %p3873_p0 }
  0x2a   : > { %3883 = shalt.err (!%p3880_p10)
}
  0x2b   : > { %s4042_s21 = smov 128   ;;  %s4043_s22 = smov 8  }
  0x2c   : > { %3304 = dma.hbm_to_vmem [thread:$0]  (!%p4144_p11), %s4363_s3, 8192, %s245_s14, [#allocation9], %s4042_s21, %s4042_s21, %s4043_s22  }
  0x2d   : > { %s4044_s10 = smov [#allocation7]   ;;  %s4045_s13 = smov [#allocation10]  }
  0x2e   : > { %s234_s11 = sshll.u32 %s4044_s10, 4  ;;  %s260_s15 = sshll.u32 %s4045_s13, 4  ;;  %s235_s11 = int_to_ptr.vmem [resolvable:$true] %s234_s11  ;;  %s261_s15 = int_to_ptr.vmem [resolvable:$true] %s260_s15 }
  0x2f   : > { %s3895_s16 = scalar_lea.vmem %s235_s11, 64  ;;  %p3903_p3 = scmp.lt.s32.totalorder %s235_s11, %s235_s11 }
  0x30   : > { %p3896_p1 = scmp.ne.s32.totalorder %s235_s11, %s3895_s16  ;;  %p3904_p7 = scmp.lt.s32.totalorder %s3895_s16, %s3895_s16 }
  0x32   : > { %p3898_p2 = pnand %p3896_p1, %p3834_p12  ;;  %p3905_p9 = por %p3904_p7, %p3903_p3 }
  0x34   : > { %p3899_p6 = pneg %p3898_p2 }
  0x36   : > { %p3906_p13 = pnand %p3905_p9, %p3899_p6 }
  0x38   : > { %3909 = shalt.err (!%p3906_p13)
}
  0x39   : > { %3301 = dma.hbm_to_vmem [thread:$0]  (!%p4144_p11), %s4362_s2, 64, %s235_s11, [#allocation6]  }
  0x3a   : > { %s3921_s18 = scalar_lea.vmem %s261_s15, 2048  ;;  %p3929_p1 = scmp.lt.s32.totalorder %s261_s15, %s261_s15 }
  0x3b   : > { %p3922_p0 = scmp.ne.s32.totalorder %s261_s15, %s3921_s18  ;;  %p3930_p2 = scmp.lt.s32.totalorder %s3921_s18, %s3921_s18 }
  0x3d   : > { %p3924_p5 = pnand %p3922_p0, %p3834_p12  ;;  %p3931_p4 = por %p3930_p2, %p3929_p1 }
  0x3f   : > { %p3925_p10 = pneg %p3924_p5 }
  0x41   : > { %p3932_p8 = pnand %p3931_p4, %p3925_p10 }
  0x43   : > { %3935 = shalt.err (!%p3932_p8)
}
  0x44   : > { %s4046_s19 = smov 64   ;;  %s4047_s20 = smov 4  }
  0x45   : > { %3307 = dma.hbm_to_vmem [thread:$0]  (!%p4144_p11), %s4365_s5, 2048, %s261_s15, [#allocation9], %s4046_s19, %s4046_s19, %s4047_s20  }
  0x46   : > { %s4183_s23 = sadd.s32 1, %s4036_s27   ;;  %s32_s10 = sadd.s32 1, %s4032_s26 }
  0x47   : > { %s29_s29 = ssub.s32 %s4036_s27, %s4183_s23  ;;  %p39_p8 = scmp.ne.s32.totalorder %s4032_s26, %s4028_s25 }
  0x48   : > { %p30_p4 = scmp.eq.s32.totalorder %s29_s29, 0  ;;  %p40_p12 = scmp.eq.s32.totalorder %s4036_s27, 0 }
  0x49   : > { %p4378_p3 = scmp.eq.s32.totalorder %s4116_s28, 1  ;;  %p3320_p9 = scmp.lt.s32.totalorder %s4036_s27, 2 }
  0x4a   : > { %s4192_s11 = scalar_select %p30_p4, %s4032_s26, %s32_s10  }
  0x4b   : > { %p41_p6 = por %p40_p12, %p39_p8  ;;  %p4196_p7 = por %p4378_p3, %p39_p8 }
  0x4c   : > { %s277_s12 = sand.u32 1, %s4032_s26   ;;  %s3273_s15 = smul.u32 896, %s4036_s27 }
  0x4d   : > { %s4379_s13 = scalar_select %p4196_p7, 1, 0 }
  0x4e   : > { %s3272_s16 = smul.u32 56, %s277_s12  ;;  %p4203_p11 = pnand %p3320_p9, %p41_p6 }
  0x4f   : > { %s4210_s19 = scalar_lea.hbm %s4360_s0, %s3273_s15  ;;  %s4214_s22 = scalar_lea.sflag [#allocation3], %s277_s12 }
  0x50   : > { %s281_s20 = scalar_lea.vmem [#allocation2], %s3272_s16  ;;  %s3936_s29 = scalar_lea.hbm %s4210_s19, 896 }
  0x51   : > { %s289_s21 = sshll.u32 %s281_s20, 4  ;;  %p3937_p13 = scmp.ne.s32.totalorder %s4210_s19, %s3936_s29  ;;  %s4212_s21 = int_to_ptr.vmem [resolvable:$true] %s289_s21 }
  0x52   : > { %p3938_p0 = pneg %p4203_p11  ;;  %s3941_s15 = scalar_lea.hbm %s4360_s0, 1792 }
  0x53   : > { %p3942_p1 = scmp.lt.s32.totalorder %s4210_s19, %s4360_s0  ;;  %p3943_p2 = scmp.lt.s32.totalorder %s3941_s15, %s3936_s29 }
  0x54   : > { %p3939_p5 = pnand %p3938_p0, %p3937_p13 }
  0x55   : > { %p3944_p4 = por %p3943_p2, %p3942_p1 }
  0x56   : > { %p3940_p10 = pneg %p3939_p5 }
  0x58   : > { %p3945_p8 = pnand %p3944_p4, %p3940_p10 }
  0x5a   : > { %3948 = shalt.err (!%p3945_p8)
}
  0x5b   : > { %s3949_s12 = scalar_lea.vmem %s4212_s21, 896  ;;  %s4048_s16 = smov [#allocation2]  }
  0x5c   : > { %p3950_p12 = scmp.ne.s32.totalorder %s4212_s21, %s3949_s12  ;;  %s3954_s20 = sshll.u32 %s4048_s16, 4  ;;  %s3955_s20 = int_to_ptr.vmem [resolvable:$false] %s3954_s20 }
  0x5d   : > { %s3956_s10 = scalar_lea.vmem %s3955_s20, 1792  ;;  %p3957_p9 = scmp.lt.s32.totalorder %s4212_s21, %s3955_s20 }
  0x5e   : > { %p3952_p6 = pnand %p3950_p12, %p3938_p0  ;;  %p3958_p13 = scmp.lt.s32.totalorder %s3956_s10, %s3949_s12 }
  0x60   : > { %p3953_p3 = pneg %p3952_p6  ;;  %p3959_p5 = por %p3958_p13, %p3957_p9 }
  0x62   : > { %p3960_p7 = pnand %p3959_p5, %p3953_p3 }
  0x64   : > { %3963 = shalt.err (!%p3960_p7)
}
  0x65   : > { %s4049_s1 = smov 448   ;;  %s4050_s29 = smov 28  }
  0x66   : > { %3311 = dma.hbm_to_vmem [thread:$0]  (!%p4203_p11), %s4210_s19, 896, %s4212_s21, %s4214_s22, %s4049_s1, %s4049_s1, %s4050_s29  }
  0x67   : > { %p4381_p0 = scmp.ne.s32.totalorder %s4375_s9, 0 }
  0x68   : > { %s4238_s17 = sand.u32 (!%p4381_p0), 1, %s4028_s25   ;;  %p4382_p7 = scmp.ne.s32.totalorder (!%p4381_p0), %s4373_s30, 0 }
  0x69   : > { %301 = sbr.rel (%p4381_p0) target bundleno = 977 (0x3d1), region = 48  ;;  %s304_s18 = scalar_lea.sflag (!%p4381_p0), [#allocation3], %s4238_s17 }
  0x6a   : > { %s3274_s15 = smul.u32 (!%p4381_p0), 56, %s4238_s17 }
  0x6c   : > { %s4242_s12 = scalar_lea.vmem (!%p4381_p0), [#allocation2], %s3274_s15 }
  0x6e   : > { %4007 = dma.done.wait (%p4382_p7), %s304_s18, 896  }
  0x6f   : > { %4009 = vsyncadd (%p4382_p7), %s304_s18, 4294966400  ;;  %p4383_p11 = scmp.eq.s32.totalorder %s4116_s28, 0 }
  0x71   : > { %4011 = dma.done.wait (%p4383_p11), [#allocation6], 28736   ;;  %p4384_p10 = pmov %p4383_p11 }
  0x73   : > { %4013 = vsyncadd (%p4384_p10), [#allocation6], 4294938560  ;;  %p4385_p1 = pmov %p4384_p10 }
  0x75   : > { %4015 = dma.done.wait (%p4385_p1), [#allocation9], 10240   ;;  %p4386_p2 = pmov %p4385_p1 }
  0x76   : > { %v3373_v0 = vld [vmem:[#allocation5 + $0xe4] ss:$16 sps:$4 sm:$0xff]   ;;  %v3377_v2 = vld [vmem:[#allocation5 + $0xe0] ss:$16 sps:$4 sm:$0xff]   ;;  %s2931_s14 = sshll.u32 %s4238_s17, 4  ;;  %s3249_s20 = sshll.u32 %s4116_s28, 8 }
  0x77   : > { %4017 = vsyncadd (%p4386_p2), [#allocation9], 4294957056  ;;  %v3375_v1 = vld [vmem:[#allocation5 + $0x2e4] ss:$16 sps:$4 sm:$0xff]   ;;  %1767 = vmatprep.subr.bf16.mxu0 %v3373_v0  ;;  %v3378_v3 = vld [vmem:[#allocation5 + $0x2e0] ss:$16 sps:$4 sm:$0xff]   ;;  %s4317_s29 = scalar_lea.hbm %s4367_s7, %s3249_s20 }
  0x78   : > { %1810 = vmatprep.subr.bf16.mxu1 %v3375_v1  ;;  %v3379_v4 = vld [vmem:[#allocation5 + $0xc4] ss:$16 sps:$4 sm:$0xff]   ;;  %1768 = vmatpush1.bf16.msra.mxu0 %v3377_v2  ;;  %v3383_v6 = vld [vmem:[#allocation5 + $0xc0] ss:$16 sps:$4 sm:$0xff]   ;;  %s353_s22 = scalar_lea.vmem [#allocation11], %s2931_s14  ;;  %s2792_s15 = scalar_lea.sflag [#allocation4], %s4238_s17 }
  0x79   : > { %1811 = vmatpush1.bf16.msra.mxu1 %v3378_v3  ;;  %v3381_v5 = vld [vmem:[#allocation5 + $0x2c4] ss:$16 sps:$4 sm:$0xff]   ;;  %1769 = vmatprep.subr.bf16.mxu0 %v3379_v4  ;;  %v3384_v7 = vld [vmem:[#allocation5 + $0x2c0] ss:$16 sps:$4 sm:$0xff]   ;;  %s2805_s16 = sshll.u32 %s353_s22, 4  ;;  %p4387_p8 = scmp.ne.s32.totalorder %s4379_s13, 0  ;;  %s4312_s16 = int_to_ptr.vmem [resolvable:$true] %s2805_s16 }
  0x7a   : > { %1812 = vmatprep.subr.bf16.mxu1 %v3381_v5  ;;  %v3385_v8 = vld [vmem:[#allocation5 + $0xa4] ss:$16 sps:$4 sm:$0xff]   ;;  %v3389_v10 = vld [vmem:[#allocation5 + $0xa0] ss:$16 sps:$4 sm:$0xff]   ;;  %s3964_s18 = scalar_lea.vmem %s4312_s16, 256  ;;  %s4052_s28 = smov [#allocation11]  }
  0x7b   : > { %v3387_v9 = vld [vmem:[#allocation5 + $0x2a4] ss:$16 sps:$4 sm:$0xff]   ;;  %v3390_v11 = vld [vmem:[#allocation5 + $0x2a0] ss:$16 sps:$4 sm:$0xff]   ;;  %p3965_p4 = scmp.ne.s32.totalorder %s4312_s16, %s3964_s18 }
  0x7c   : > { %1770 = vmatpush1.bf16.msra.mxu0 %v3383_v6  ;;  %v3391_v12 = vld [vmem:[#allocation5 + $0x84] ss:$16 sps:$4 sm:$0xff]   ;;  %v3395_v14 = vld [vmem:[#allocation5 + $0x80] ss:$16 sps:$4 sm:$0xff]  }
  0x7d   : > { %1813 = vmatpush1.bf16.msra.mxu1 %v3384_v7  ;;  %1771 = vmatprep.subr.bf16.mxu0 %v3385_v8  ;;  %v3393_v13 = vld [vmem:[#allocation5 + $0x284] ss:$16 sps:$4 sm:$0xff]   ;;  %v3396_v15 = vld [vmem:[#allocation5 + $0x280] ss:$16 sps:$4 sm:$0xff]   ;;  %p3966_p12 = pnand %p3965_p4, %p4387_p8 }
  0x7e   : > { %1814 = vmatprep.subr.bf16.mxu1 %v3387_v9  ;;  %v3397_v16 = vld [vmem:[#allocation5 + $0x64] ss:$16 sps:$4 sm:$0xff]   ;;  %v3401_v18 = vld [vmem:[#allocation5 + $0x60] ss:$16 sps:$4 sm:$0xff]  }
  0x7f   : > { %v3399_v17 = vld [vmem:[#allocation5 + $0x264] ss:$16 sps:$4 sm:$0xff]   ;;  %v3402_v19 = vld [vmem:[#allocation5 + $0x260] ss:$16 sps:$4 sm:$0xff]   ;;  %p3967_p6 = pneg %p3966_p12 }
  0x80   : > { %1772 = vmatpush1.bf16.msra.mxu0 %v3389_v10  ;;  %v3403_v20 = vld [vmem:[#allocation5 + $0x44] ss:$16 sps:$4 sm:$0xff]   ;;  %v3407_v22 = vld [vmem:[#allocation5 + $0x40] ss:$16 sps:$4 sm:$0xff]  }
  0x81   : > { %1815 = vmatpush1.bf16.msra.mxu1 %v3390_v11  ;;  %1773 = vmatprep.subr.bf16.mxu0 %v3391_v12  ;;  %v3405_v21 = vld [vmem:[#allocation5 + $0x244] ss:$16 sps:$4 sm:$0xff]   ;;  %v3408_v23 = vld [vmem:[#allocation5 + $0x240] ss:$16 sps:$4 sm:$0xff]  }
  0x82   : > { %1816 = vmatprep.subr.bf16.mxu1 %v3393_v13  ;;  %v3409_v24 = vld [vmem:[#allocation5 + $0x24] ss:$16 sps:$4 sm:$0xff]   ;;  %v3413_v26 = vld [vmem:[#allocation5 + $0x20] ss:$16 sps:$4 sm:$0xff]  }
  0x83   : > { %v3411_v25 = vld [vmem:[#allocation5 + $0x224] ss:$16 sps:$4 sm:$0xff]   ;;  %v3414_v27 = vld [vmem:[#allocation5 + $0x220] ss:$16 sps:$4 sm:$0xff]  }
  0x84   : > { %1774 = vmatpush1.bf16.msra.mxu0 %v3395_v14  ;;  %v3415_v28 = vld [vmem:[#allocation5 + $0x4] ss:$16 sps:$4 sm:$0xff]   ;;  %v3419_v30 = vld [vmem:[#allocation5] ss:$16 sps:$4 sm:$0xff]   ;;  %v4051_v14 = vmov 0  }
  0x85   : > { %1817 = vmatpush1.bf16.msra.mxu1 %v3396_v15  ;;  %1775 = vmatprep.subr.bf16.mxu0 %v3397_v16  ;;  %v3417_v29 = vld [vmem:[#allocation5 + $0x204] ss:$16 sps:$4 sm:$0xff]   ;;  %v3420_v31 = vld [vmem:[#allocation5 + $0x200] ss:$16 sps:$4 sm:$0xff]  }
  0x86   : > { %1818 = vmatprep.subr.bf16.mxu1 %v3399_v17  ;;  %v3421_v32 = vld [vmem:[#allocation5 + $0x1e4] ss:$16 sps:$4 sm:$0xff]   ;;  %v3425_v34 = vld [vmem:[#allocation5 + $0x1e0] ss:$16 sps:$4 sm:$0xff]  }
  0x87   : > { %v3423_v33 = vld [vmem:[#allocation5 + $0x3e4] ss:$16 sps:$4 sm:$0xff]   ;;  %v3426_v35 = vld [vmem:[#allocation5 + $0x3e0] ss:$16 sps:$4 sm:$0xff]  }
  0x88   : > { %1776 = vmatpush1.bf16.msra.mxu0 %v3401_v18  ;;  %v3427_v36 = vld [vmem:[#allocation5 + $0x1c4] ss:$16 sps:$4 sm:$0xff]   ;;  %v3431_v38 = vld [vmem:[#allocation5 + $0x1c0] ss:$16 sps:$4 sm:$0xff]  }
  0x89   : > { %1819 = vmatpush1.bf16.msra.mxu1 %v3402_v19  ;;  %1777 = vmatprep.subr.bf16.mxu0 %v3403_v20  ;;  %v3429_v37 = vld [vmem:[#allocation5 + $0x3c4] ss:$16 sps:$4 sm:$0xff]   ;;  %v3432_v39 = vld [vmem:[#allocation5 + $0x3c0] ss:$16 sps:$4 sm:$0xff]  }
  0x8a   : > { %1820 = vmatprep.subr.bf16.mxu1 %v3405_v21  ;;  %v3433_v40 = vld [vmem:[#allocation5 + $0x1a4] ss:$16 sps:$4 sm:$0xff]   ;;  %v3437_v42 = vld [vmem:[#allocation5 + $0x1a0] ss:$16 sps:$4 sm:$0xff]  }
  0x8b   : > { %v3435_v41 = vld [vmem:[#allocation5 + $0x3a4] ss:$16 sps:$4 sm:$0xff]   ;;  %v3438_v43 = vld [vmem:[#allocation5 + $0x3a0] ss:$16 sps:$4 sm:$0xff]  }
  0x8c   : > { %1778 = vmatpush1.bf16.msra.mxu0 %v3407_v22  ;;  %v3439_v44 = vld [vmem:[#allocation5 + $0x184] ss:$16 sps:$4 sm:$0xff]   ;;  %v3443_v46 = vld [vmem:[#allocation5 + $0x180] ss:$16 sps:$4 sm:$0xff]  }
  0x8d   : > { %1821 = vmatpush1.bf16.msra.mxu1 %v3408_v23  ;;  %1779 = vmatprep.subr.bf16.mxu0 %v3409_v24  ;;  %v3441_v45 = vld [vmem:[#allocation5 + $0x384] ss:$16 sps:$4 sm:$0xff]   ;;  %v3444_v47 = vld [vmem:[#allocation5 + $0x380] ss:$16 sps:$4 sm:$0xff]  }
  0x8e   : > { %1822 = vmatprep.subr.bf16.mxu1 %v3411_v25  ;;  %v3445_v48 = vld [vmem:[#allocation5 + $0x164] ss:$16 sps:$4 sm:$0xff]   ;;  %v3449_v52 = vld [vmem:[#allocation5 + $0x160] ss:$16 sps:$4 sm:$0xff]  }
  0x8f   : > { %v4257_v49 = vld [vmem:[%s4242_s12 + $0x4] ss:$28 sps:$4 sm:$0xff]   ;;  %v4260_v51 = vld [vmem:[%s4242_s12 + $0xc] ss:$28 sps:$4 sm:$0xff]  }
  0x90   : > { %1780 = vmatpush1.bf16.msra.mxu0 %v3413_v26  ;;  %v3447_v50 = vld [vmem:[#allocation5 + $0x364] ss:$16 sps:$4 sm:$0xff]   ;;  %1799 = vmatprep.mubr.bf16.mxu0 %v4257_v49  ;;  %v3450_v53 = vld [vmem:[#allocation5 + $0x360] ss:$16 sps:$4 sm:$0xff]  }
  0x91   : > { %1823 = vmatpush1.bf16.msra.mxu1 %v3414_v27  ;;  %1781 = vmatprep.subr.bf16.mxu0 %v3415_v28  ;;  %v3451_v54 = vld [vmem:[#allocation5 + $0x144] ss:$16 sps:$4 sm:$0xff]   ;;  %v3455_v56 = vld [vmem:[#allocation5 + $0x140] ss:$16 sps:$4 sm:$0xff]  }
  0x92   : > { %1824 = vmatprep.subr.bf16.mxu1 %v3417_v29  ;;  %1842 = vmatprep.mubr.bf16.mxu1 %v4260_v51  ;;  %v3453_v55 = vld [vmem:[#allocation5 + $0x344] ss:$16 sps:$4 sm:$0xff]   ;;  %v3456_v57 = vld [vmem:[#allocation5 + $0x340] ss:$16 sps:$4 sm:$0xff]  }
  0x93   : > { %v3457_v58 = vld [vmem:[#allocation5 + $0x124] ss:$16 sps:$4 sm:$0xff]   ;;  %v3461_v60 = vld [vmem:[#allocation5 + $0x120] ss:$16 sps:$4 sm:$0xff]  }
  0x94   : > { %1782 = vmatpush1.bf16.msra.mxu0 %v3419_v30  ;;  %v3459_v59 = vld [vmem:[#allocation5 + $0x324] ss:$16 sps:$4 sm:$0xff]   ;;  %v3462_v61 = vld [vmem:[#allocation5 + $0x320] ss:$16 sps:$4 sm:$0xff]  }
  0x95   : > { %1825 = vmatpush1.bf16.msra.mxu1 %v3420_v31  ;;  %1783 = vmatprep.subr.bf16.mxu0 %v3421_v32  ;;  %v3463_v62 = vld [vmem:[#allocation5 + $0x104] ss:$16 sps:$4 sm:$0xff]   ;;  %v3467_v0 = vld [vmem:[#allocation5 + $0x100] ss:$16 sps:$4 sm:$0xff]  }
  0x96   : > { %1826 = vmatprep.subr.bf16.mxu1 %v3423_v33  ;;  %v3465_v63 = vld [vmem:[#allocation5 + $0x304] ss:$16 sps:$4 sm:$0xff]   ;;  %v3468_v1 = vld [vmem:[#allocation5 + $0x300] ss:$16 sps:$4 sm:$0xff]  }
  0x97   : > { %v3477_v2 = vld [vmem:[#allocation5 + $0x4e4] ss:$16 sps:$4 sm:$0xff]   ;;  %v3475_v6 = vld [vmem:[#allocation5 + $0x4e0] ss:$16 sps:$4 sm:$0xff]  }
  0x98   : > { %1784 = vmatpush2.bf16.msra.mxu0 %v3425_v34  ;;  %v3480_v3 = vld [vmem:[#allocation5 + $0x6e4] ss:$16 sps:$4 sm:$0xff]   ;;  %v3478_v7 = vld [vmem:[#allocation5 + $0x6e0] ss:$16 sps:$4 sm:$0xff]  }
  0x99   : > { %1827 = vmatpush2.bf16.msra.mxu1 %v3426_v35  ;;  %1785 = vmatprep.subr.bf16.mxu0 %v3427_v36  ;;  %v4265_v4 = vld [vmem:[%s4242_s12] ss:$28 sps:$4 sm:$0xff]   ;;  %v3472_v5 = vld [vmem:[%s4242_s12 + $0x8] ss:$28 sps:$4 sm:$0xff]   ;;  %v4271_v35 = vld [vmem:[%s4242_s12 + $0x14] ss:$28 sps:$4 sm:$0xff]  }
  0x9a   : > { %1828 = vmatprep.subr.bf16.mxu1 %v3429_v37  ;;  %v3483_v8 = vld [vmem:[#allocation5 + $0x4c4] ss:$16 sps:$4 sm:$0xff]   ;;  %v3481_v10 = vld [vmem:[#allocation5 + $0x4c0] ss:$16 sps:$4 sm:$0xff]  }
  0x9b   : > { %v3486_v9 = vld [vmem:[#allocation5 + $0x6c4] ss:$16 sps:$4 sm:$0xff]   ;;  %v3484_v11 = vld [vmem:[#allocation5 + $0x6c0] ss:$16 sps:$4 sm:$0xff]  }
  0x9c   : > { %1786 = vmatpush2.bf16.msra.mxu0 %v3431_v38  ;;  %v3489_v12 = vld [vmem:[#allocation5 + $0x4a4] ss:$16 sps:$4 sm:$0xff]   ;;  %v3487_v15 = vld [vmem:[#allocation5 + $0x4a0] ss:$16 sps:$4 sm:$0xff]  }
  0x9d   : > { %1829 = vmatpush2.bf16.msra.mxu1 %v3432_v39  ;;  %1787 = vmatprep.subr.bf16.mxu0 %v3433_v40  ;;  %v3492_v13 = vld [vmem:[#allocation5 + $0x6a4] ss:$16 sps:$4 sm:$0xff]   ;;  %v3490_v16 = vld [vmem:[#allocation5 + $0x6a0] ss:$16 sps:$4 sm:$0xff]   ;;  %v3529_v39 = vld [vmem:[#allocation5 + $0xec] ss:$16 sps:$4 sm:$0xff]  }
  0x9e   : > { %1830 = vmatprep.subr.bf16.mxu1 %v3435_v41  ;;  %v3495_v17 = vld [vmem:[#allocation5 + $0x484] ss:$16 sps:$4 sm:$0xff]   ;;  %v3493_v19 = vld [vmem:[#allocation5 + $0x480] ss:$16 sps:$4 sm:$0xff]  }
  0x9f   : > { %v3498_v18 = vld [vmem:[#allocation5 + $0x684] ss:$16 sps:$4 sm:$0xff]   ;;  %v3496_v20 = vld [vmem:[#allocation5 + $0x680] ss:$16 sps:$4 sm:$0xff]  }
  0xa0   : > { %1788 = vmatpush2.bf16.msra.mxu0 %v3437_v42  ;;  %v3501_v21 = vld [vmem:[#allocation5 + $0x464] ss:$16 sps:$4 sm:$0xff]   ;;  %v3499_v23 = vld [vmem:[#allocation5 + $0x460] ss:$16 sps:$4 sm:$0xff]   ;;  %v3527_v42 = vld [vmem:[#allocation5 + $0xe8] ss:$16 sps:$4 sm:$0xff]  }
  0xa1   : > { %1831 = vmatpush2.bf16.msra.mxu1 %v3438_v43  ;;  %1789 = vmatprep.subr.bf16.mxu0 %v3439_v44  ;;  %v3504_v22 = vld [vmem:[#allocation5 + $0x664] ss:$16 sps:$4 sm:$0xff]   ;;  %v3502_v24 = vld [vmem:[#allocation5 + $0x660] ss:$16 sps:$4 sm:$0xff]   ;;  %v3535_v44 = vld [vmem:[#allocation5 + $0xcc] ss:$16 sps:$4 sm:$0xff]  }
  0xa2   : > { %1832 = vmatprep.subr.bf16.mxu1 %v3441_v45  ;;  %v3507_v25 = vld [vmem:[#allocation5 + $0x444] ss:$16 sps:$4 sm:$0xff]   ;;  %v3505_v27 = vld [vmem:[#allocation5 + $0x440] ss:$16 sps:$4 sm:$0xff]  }
  0xa3   : > { %v3510_v26 = vld [vmem:[#allocation5 + $0x644] ss:$16 sps:$4 sm:$0xff]   ;;  %v3508_v28 = vld [vmem:[#allocation5 + $0x640] ss:$16 sps:$4 sm:$0xff]  }
  0xa4   : > { %1790 = vmatpush2.bf16.msra.mxu0 %v3443_v46  ;;  %v3513_v29 = vld [vmem:[#allocation5 + $0x424] ss:$16 sps:$4 sm:$0xff]   ;;  %v3511_v31 = vld [vmem:[#allocation5 + $0x420] ss:$16 sps:$4 sm:$0xff]   ;;  %v3533_v46 = vld [vmem:[#allocation5 + $0xc8] ss:$16 sps:$4 sm:$0xff]  }
  0xa5   : > { %1833 = vmatpush2.bf16.msra.mxu1 %v3444_v47  ;;  %1791 = vmatprep.subr.bf16.mxu0 %v3445_v48  ;;  %v3516_v30 = vld [vmem:[#allocation5 + $0x624] ss:$16 sps:$4 sm:$0xff]   ;;  %v3514_v32 = vld [vmem:[#allocation5 + $0x620] ss:$16 sps:$4 sm:$0xff]   ;;  %v3541_v48 = vld [vmem:[#allocation5 + $0xac] ss:$16 sps:$4 sm:$0xff]  }
  0xa6   : > { %1834 = vmatprep.subr.bf16.mxu1 %v3447_v50  ;;  %v3519_v33 = vld [vmem:[#allocation5 + $0x404] ss:$16 sps:$4 sm:$0xff]   ;;  %v3517_v36 = vld [vmem:[#allocation5 + $0x400] ss:$16 sps:$4 sm:$0xff]  }
  0xa7   : > { %v3522_v34 = vld [vmem:[#allocation5 + $0x604] ss:$16 sps:$4 sm:$0xff]   ;;  %v3520_v37 = vld [vmem:[#allocation5 + $0x600] ss:$16 sps:$4 sm:$0xff]  }
  0xa8   : > { %1792 = vmatpush2.bf16.msra.mxu0 %v3449_v52  ;;  %v3525_v38 = vld [vmem:[#allocation5 + $0x5e4] ss:$16 sps:$4 sm:$0xff]   ;;  %v3523_v40 = vld [vmem:[#allocation5 + $0x5e0] ss:$16 sps:$4 sm:$0xff]   ;;  %v3539_v52 = vld [vmem:[#allocation5 + $0xa8] ss:$16 sps:$4 sm:$0xff]  }
  0xa9   : > { %1835 = vmatpush2.bf16.msra.mxu1 %v3450_v53  ;;  %1793 = vmatprep.subr.bf16.mxu0 %v3451_v54  ;;  %v4275_v41 = vld [vmem:[%s4242_s12 + $0x18] ss:$28 sps:$4 sm:$0xff]  }
  0xaa   : > { %1836 = vmatprep.subr.bf16.mxu1 %v3453_v55  ;;  %v3532_v43 = vld [vmem:[#allocation5 + $0x5c4] ss:$16 sps:$4 sm:$0xff]   ;;  %v3530_v45 = vld [vmem:[#allocation5 + $0x5c0] ss:$16 sps:$4 sm:$0xff]   ;;  %v3547_v54 = vld [vmem:[#allocation5 + $0x8c] ss:$16 sps:$4 sm:$0xff]  }
  0xab   : > { %v3538_v47 = vld [vmem:[#allocation5 + $0x5a4] ss:$16 sps:$4 sm:$0xff]   ;;  %v3536_v50 = vld [vmem:[#allocation5 + $0x5a0] ss:$16 sps:$4 sm:$0xff]  }
  0xac   : > { %1794 = vmatpush2.bf16.msra.mxu0 %v3455_v56  ;;  %v3544_v53 = vld [vmem:[#allocation5 + $0x584] ss:$16 sps:$4 sm:$0xff]   ;;  %v3542_v55 = vld [vmem:[#allocation5 + $0x580] ss:$16 sps:$4 sm:$0xff]   ;;  %v3545_v56 = vld [vmem:[#allocation5 + $0x88] ss:$16 sps:$4 sm:$0xff]  }
  0xad   : > { %1837 = vmatpush2.bf16.msra.mxu1 %v3456_v57  ;;  %1795 = vmatprep.subr.bf16.mxu0 %v3457_v58  ;;  %v3550_v57 = vld [vmem:[#allocation5 + $0x564] ss:$16 sps:$4 sm:$0xff]   ;;  %v3553_v58 = vld [vmem:[#allocation5 + $0x6c] ss:$16 sps:$4 sm:$0xff]  }
  0xae   : > { %1838 = vmatprep.subr.bf16.mxu1 %v3459_v59  ;;  %v3548_v59 = vld [vmem:[#allocation5 + $0x560] ss:$16 sps:$4 sm:$0xff]  }
  0xb0   : > { %1796 = vmatpush2.bf16.msra.mxu0 %v3461_v60  ;;  %v3556_v60 = vld [vmem:[#allocation5 + $0x544] ss:$16 sps:$4 sm:$0xff]  }
  0xb1   : > { %1839 = vmatpush2.bf16.msra.mxu1 %v3462_v61  ;;  %1797 = vmatprep.subr.bf16.mxu0 %v3463_v62  ;;  %v3559_v61 = vld [vmem:[#allocation5 + $0x4c] ss:$16 sps:$4 sm:$0xff]   ;;  %v3554_v62 = vld [vmem:[#allocation5 + $0x540] ss:$16 sps:$4 sm:$0xff]  }
  0xb2   : > { %1840 = vmatprep.subr.bf16.mxu1 %v3465_v63  ;;  %v3557_v63 = vld [vmem:[#allocation5 + $0x48] ss:$16 sps:$4 sm:$0xff]  }
  0xb4   : > { %1798 = vmatpush2.bf16.msra.mxu0 %v3467_v0  ;;  %v3562_v0 = vld [vmem:[#allocation5 + $0x524] ss:$16 sps:$4 sm:$0xff]  }
  0xb5   : > { %1841 = vmatpush2.bf16.msra.mxu1 %v3468_v1  ;;  %1853 = vmatprep.subr.bf16.mxu0 %v3477_v2  ;;  %v3565_v1 = vld [vmem:[#allocation5 + $0x2c] ss:$16 sps:$4 sm:$0xff]   ;;  %v3560_v2 = vld [vmem:[#allocation5 + $0x520] ss:$16 sps:$4 sm:$0xff]  }
  0xb6   : > { %1896 = vmatprep.subr.bf16.mxu1 %v3480_v3  ;;  %v3563_v3 = vld [vmem:[#allocation5 + $0x28] ss:$16 sps:$4 sm:$0xff]  }
  0xb7   : > { %1800 = vmatmul.mubr.bf16.vlgmr.msra.gmra.mxu0 %v4265_v4 }
  0xb8   : > { %1843 = vmatmul.mubr.bf16.vlgmr.msra.gmra.mxu1 %v3472_v5  ;;  %1854 = vmatpush1.bf16.msra.mxu0 %v3475_v6  ;;  %v3568_v5 = vld [vmem:[#allocation5 + $0x504] ss:$16 sps:$4 sm:$0xff]   ;;  %v3571_v6 = vld [vmem:[#allocation5 + $0xc] ss:$16 sps:$4 sm:$0xff]  }
  0xb9   : > { %1897 = vmatpush1.bf16.msra.mxu1 %v3478_v7  ;;  %1855 = vmatprep.subr.bf16.mxu0 %v3483_v8  ;;  %v3566_v7 = vld [vmem:[#allocation5 + $0x500] ss:$16 sps:$4 sm:$0xff]   ;;  %v3569_v8 = vld [vmem:[#allocation5 + $0x8] ss:$16 sps:$4 sm:$0xff]  }
  0xba   : > { %1898 = vmatprep.subr.bf16.mxu1 %v3486_v9  ;;  %1928 = vmatprep.mubr.bf16.mxu1 %v4051_v14  ;;  %v3577_v9 = vld [vmem:[#allocation5 + $0x1ec] ss:$16 sps:$4 sm:$0xff]  }
  0xbb   : > { %1885 = vmatprep.mubr.bf16.mxu0 %v4271_v35 }
  0xbc   : > { %1856 = vmatpush1.bf16.msra.mxu0 %v3481_v10  ;;  %v3580_v10 = vld [vmem:[#allocation5 + $0x2ec] ss:$16 sps:$4 sm:$0xff]  }
  0xbd   : > { %1899 = vmatpush1.bf16.msra.mxu1 %v3484_v11  ;;  %1857 = vmatprep.subr.bf16.mxu0 %v3489_v12  ;;  %v4280_v11 = vld [vmem:[%s4242_s12 + $0x10] ss:$28 sps:$4 sm:$0xff]  }
  0xbe   : > { %1900 = vmatprep.subr.bf16.mxu1 %v3492_v13  ;;  %v3575_v12 = vld [vmem:[#allocation5 + $0x1e8] ss:$16 sps:$4 sm:$0xff]  }
  0xbf   : > { %v3578_v13 = vld [vmem:[#allocation5 + $0x2e8] ss:$16 sps:$4 sm:$0xff]  }
  0xc0   : > { %1858 = vmatpush1.bf16.msra.mxu0 %v3487_v15  ;;  %v3583_v15 = vld [vmem:[#allocation5 + $0x1cc] ss:$16 sps:$4 sm:$0xff]  }
  0xc1   : > { %1901 = vmatpush1.bf16.msra.mxu1 %v3490_v16  ;;  %1859 = vmatprep.subr.bf16.mxu0 %v3495_v17  ;;  %v3586_v16 = vld [vmem:[#allocation5 + $0x2cc] ss:$16 sps:$4 sm:$0xff]   ;;  %v3581_v17 = vld [vmem:[#allocation5 + $0x1c8] ss:$16 sps:$4 sm:$0xff]  }
  0xc2   : > { %1902 = vmatprep.subr.bf16.mxu1 %v3498_v18  ;;  %v3584_v18 = vld [vmem:[#allocation5 + $0x2c8] ss:$16 sps:$4 sm:$0xff]  }
  0xc4   : > { %1860 = vmatpush1.bf16.msra.mxu0 %v3493_v19  ;;  %v3589_v19 = vld [vmem:[#allocation5 + $0x1ac] ss:$16 sps:$4 sm:$0xff]  }
  0xc5   : > { %1903 = vmatpush1.bf16.msra.mxu1 %v3496_v20  ;;  %1861 = vmatprep.subr.bf16.mxu0 %v3501_v21  ;;  %v3592_v20 = vld [vmem:[#allocation5 + $0x2ac] ss:$16 sps:$4 sm:$0xff]   ;;  %v3587_v21 = vld [vmem:[#allocation5 + $0x1a8] ss:$16 sps:$4 sm:$0xff]  }
  0xc6   : > { %1904 = vmatprep.subr.bf16.mxu1 %v3504_v22  ;;  %v3590_v22 = vld [vmem:[#allocation5 + $0x2a8] ss:$16 sps:$4 sm:$0xff]  }
  0xc8   : > { %1862 = vmatpush1.bf16.msra.mxu0 %v3499_v23  ;;  %v3595_v23 = vld [vmem:[#allocation5 + $0x18c] ss:$16 sps:$4 sm:$0xff]  }
  0xc9   : > { %1905 = vmatpush1.bf16.msra.mxu1 %v3502_v24  ;;  %1863 = vmatprep.subr.bf16.mxu0 %v3507_v25  ;;  %v3598_v24 = vld [vmem:[#allocation5 + $0x28c] ss:$16 sps:$4 sm:$0xff]   ;;  %v3593_v25 = vld [vmem:[#allocation5 + $0x188] ss:$16 sps:$4 sm:$0xff]  }
  0xca   : > { %1906 = vmatprep.subr.bf16.mxu1 %v3510_v26  ;;  %v3596_v26 = vld [vmem:[#allocation5 + $0x288] ss:$16 sps:$4 sm:$0xff]  }
  0xcc   : > { %1864 = vmatpush1.bf16.msra.mxu0 %v3505_v27  ;;  %v3601_v27 = vld [vmem:[#allocation5 + $0x16c] ss:$16 sps:$4 sm:$0xff]  }
  0xcd   : > { %1907 = vmatpush1.bf16.msra.mxu1 %v3508_v28  ;;  %1865 = vmatprep.subr.bf16.mxu0 %v3513_v29  ;;  %v3604_v28 = vld [vmem:[#allocation5 + $0x26c] ss:$16 sps:$4 sm:$0xff]   ;;  %v3599_v29 = vld [vmem:[#allocation5 + $0x168] ss:$16 sps:$4 sm:$0xff]  }
  0xce   : > { %1908 = vmatprep.subr.bf16.mxu1 %v3516_v30  ;;  %v3607_v30 = vld [vmem:[#allocation5 + $0x14c] ss:$16 sps:$4 sm:$0xff]  }
  0xd0   : > { %1866 = vmatpush1.bf16.msra.mxu0 %v3511_v31  ;;  %v3610_v31 = vld [vmem:[#allocation5 + $0x24c] ss:$16 sps:$4 sm:$0xff]  }
  0xd1   : > { %1909 = vmatpush1.bf16.msra.mxu1 %v3514_v32  ;;  %1867 = vmatprep.subr.bf16.mxu0 %v3519_v33  ;;  %v3605_v32 = vld [vmem:[#allocation5 + $0x148] ss:$16 sps:$4 sm:$0xff]  }
  0xd2   : > { %1910 = vmatprep.subr.bf16.mxu1 %v3522_v34  ;;  %v3608_v33 = vld [vmem:[#allocation5 + $0x248] ss:$16 sps:$4 sm:$0xff]   ;;  %v3613_v34 = vld [vmem:[#allocation5 + $0x12c] ss:$16 sps:$4 sm:$0xff]  }
  0xd4   : > { %1868 = vmatpush1.bf16.msra.mxu0 %v3517_v36  ;;  %v3616_v36 = vld [vmem:[#allocation5 + $0x22c] ss:$16 sps:$4 sm:$0xff]  }
  0xd5   : > { %1911 = vmatpush1.bf16.msra.mxu1 %v3520_v37  ;;  %1869 = vmatprep.subr.bf16.mxu0 %v3525_v38  ;;  %v3611_v37 = vld [vmem:[#allocation5 + $0x128] ss:$16 sps:$4 sm:$0xff]  }
  0xd6   : > { %1939 = vmatprep.subr.bf16.mxu1 %v3529_v39  ;;  %v3614_v38 = vld [vmem:[#allocation5 + $0x228] ss:$16 sps:$4 sm:$0xff]   ;;  %v3619_v39 = vld [vmem:[#allocation5 + $0x10c] ss:$16 sps:$4 sm:$0xff]  }
  0xd8   : > { %1929 = vmatmul.mubr.bf16.vlgmr.msra.gmra.mxu1 %v4275_v41  ;;  %1870 = vmatpush2.bf16.msra.mxu0 %v3523_v40  ;;  %v3622_v40 = vld [vmem:[#allocation5 + $0x20c] ss:$16 sps:$4 sm:$0xff]  }
  0xd9   : > { %1940 = vmatpush1.bf16.msra.mxu1 %v3527_v42  ;;  %1871 = vmatprep.subr.bf16.mxu0 %v3532_v43  ;;  %v3617_v42 = vld [vmem:[#allocation5 + $0x108] ss:$16 sps:$4 sm:$0xff]  }
  0xda   : > { %1941 = vmatprep.subr.bf16.mxu1 %v3535_v44  ;;  %1971 = vmatprep.mubr.bf16.mxu1 %v4257_v49  ;;  %v3551_v49 = vld [vmem:[#allocation5 + $0x68] ss:$16 sps:$4 sm:$0xff]   ;;  %v3625_v44 = vld [vmem:[#allocation5 + $0x3ec] ss:$16 sps:$4 sm:$0xff]  }
  0xdb   : > { %v3620_v43 = vld [vmem:[#allocation5 + $0x208] ss:$16 sps:$4 sm:$0xff]  }
  0xdc   : > { %1872 = vmatpush2.bf16.msra.mxu0 %v3530_v45  ;;  %v3628_v45 = vld [vmem:[#allocation5 + $0x4ec] ss:$16 sps:$4 sm:$0xff]  }
  0xdd   : > { %1942 = vmatpush1.bf16.msra.mxu1 %v3533_v46  ;;  %1873 = vmatprep.subr.bf16.mxu0 %v3538_v47  ;;  %v3623_v46 = vld [vmem:[#allocation5 + $0x3e8] ss:$16 sps:$4 sm:$0xff]  }
  0xde   : > { %1943 = vmatprep.subr.bf16.mxu1 %v3541_v48  ;;  %v3626_v47 = vld [vmem:[#allocation5 + $0x4e8] ss:$16 sps:$4 sm:$0xff]   ;;  %v3631_v48 = vld [vmem:[#allocation5 + $0x3cc] ss:$16 sps:$4 sm:$0xff]  }
  0xe0   : > { %1874 = vmatpush2.bf16.msra.mxu0 %v3536_v50  ;;  %v3634_v50 = vld [vmem:[#allocation5 + $0x4cc] ss:$16 sps:$4 sm:$0xff]  }
  0xe1   : > { %1944 = vmatpush1.bf16.msra.mxu1 %v3539_v52  ;;  %1875 = vmatprep.subr.bf16.mxu0 %v3544_v53  ;;  %v3629_v52 = vld [vmem:[#allocation5 + $0x3c8] ss:$16 sps:$4 sm:$0xff]  }
  0xe2   : > { %1945 = vmatprep.subr.bf16.mxu1 %v3547_v54  ;;  %v3632_v53 = vld [vmem:[#allocation5 + $0x4c8] ss:$16 sps:$4 sm:$0xff]   ;;  %v3637_v54 = vld [vmem:[#allocation5 + $0x3ac] ss:$16 sps:$4 sm:$0xff]  }
  0xe4   : > { %1876 = vmatpush2.bf16.msra.mxu0 %v3542_v55  ;;  %v3640_v55 = vld [vmem:[#allocation5 + $0x4ac] ss:$16 sps:$4 sm:$0xff]  }
  0xe5   : > { %1946 = vmatpush1.bf16.msra.mxu1 %v3545_v56  ;;  %1877 = vmatprep.subr.bf16.mxu0 %v3550_v57  ;;  %v3635_v56 = vld [vmem:[#allocation5 + $0x3a8] ss:$16 sps:$4 sm:$0xff]  }
  0xe6   : > { %1947 = vmatprep.subr.bf16.mxu1 %v3553_v58  ;;  %v3638_v57 = vld [vmem:[#allocation5 + $0x4a8] ss:$16 sps:$4 sm:$0xff]   ;;  %v3643_v58 = vld [vmem:[#allocation5 + $0x38c] ss:$16 sps:$4 sm:$0xff]  }
  0xe8   : > { %1878 = vmatpush2.bf16.msra.mxu0 %v3548_v59  ;;  %v3646_v59 = vld [vmem:[#allocation5 + $0x48c] ss:$16 sps:$4 sm:$0xff]  }
  0xe9   : > { %1948 = vmatpush1.bf16.msra.mxu1 %v3551_v49  ;;  %1879 = vmatprep.subr.bf16.mxu0 %v3556_v60  ;;  %v3641_v49 = vld [vmem:[#allocation5 + $0x388] ss:$16 sps:$4 sm:$0xff]   ;;  %v3649_v60 = vld [vmem:[#allocation5 + $0x36c] ss:$16 sps:$4 sm:$0xff]  }
  0xea   : > { %1949 = vmatprep.subr.bf16.mxu1 %v3559_v61  ;;  %v3652_v61 = vld [vmem:[#allocation5 + $0x46c] ss:$16 sps:$4 sm:$0xff]  }
  0xec   : > { %1880 = vmatpush2.bf16.msra.mxu0 %v3554_v62  ;;  %v3647_v62 = vld [vmem:[#allocation5 + $0x368] ss:$16 sps:$4 sm:$0xff]  }
  0xed   : > { %1950 = vmatpush1.bf16.msra.mxu1 %v3557_v63  ;;  %1881 = vmatprep.subr.bf16.mxu0 %v3562_v0  ;;  %v3650_v63 = vld [vmem:[#allocation5 + $0x468] ss:$16 sps:$4 sm:$0xff]   ;;  %v3655_v0 = vld [vmem:[#allocation5 + $0x34c] ss:$16 sps:$4 sm:$0xff]  }
  0xee   : > { %1951 = vmatprep.subr.bf16.mxu1 %v3565_v1  ;;  %v3658_v1 = vld [vmem:[#allocation5 + $0x44c] ss:$16 sps:$4 sm:$0xff]  }
  0xf0   : > { %1882 = vmatpush2.bf16.msra.mxu0 %v3560_v2  ;;  %v3656_v2 = vld [vmem:[#allocation5 + $0x448] ss:$16 sps:$4 sm:$0xff]  }
  0xf1   : > { %1952 = vmatpush1.bf16.msra.mxu1 %v3563_v3  ;;  %1883 = vmatprep.subr.bf16.mxu0 %v3568_v5  ;;  %v3661_v3 = vld [vmem:[#allocation5 + $0x32c] ss:$16 sps:$4 sm:$0xff]  }
  0xf2   : > { %1953 = vmatprep.subr.bf16.mxu1 %v3571_v6  ;;  %v3664_v5 = vld [vmem:[#allocation5 + $0x42c] ss:$16 sps:$4 sm:$0xff]   ;;  %v3659_v6 = vld [vmem:[#allocation5 + $0x328] ss:$16 sps:$4 sm:$0xff]  }
  0xf4   : > { %1884 = vmatpush2.bf16.msra.mxu0 %v3566_v7  ;;  %v3662_v7 = vld [vmem:[#allocation5 + $0x428] ss:$16 sps:$4 sm:$0xff]  }
  0xf5   : > { %1954 = vmatpush1.bf16.msra.mxu1 %v3569_v8  ;;  %1982 = vmatprep.subr.bf16.mxu0 %v3580_v10  ;;  %v3667_v8 = vld [vmem:[#allocation5 + $0x30c] ss:$16 sps:$4 sm:$0xff]   ;;  %v3665_v10 = vld [vmem:[#allocation5 + $0x308] ss:$16 sps:$4 sm:$0xff]  }
  0xf6   : > { %1955 = vmatprep.subr.bf16.mxu1 %v3577_v9  ;;  %v3670_v9 = vld [vmem:[#allocation5 + $0x40c] ss:$16 sps:$4 sm:$0xff]  }
  0xf7   : > { %1886 = vmatmul.mubr.bf16.vlgmr.msra.gmra.mxu0 %v4280_v11 }
  0xf8   : > { %1983 = vmatpush1.bf16.msra.mxu0 %v3578_v13  ;;  %2014 = vmatprep.mubr.bf16.mxu0 %v4260_v51  ;;  %v3602_v51 = vld [vmem:[#allocation5 + $0x268] ss:$16 sps:$4 sm:$0xff]   ;;  %v3673_v13 = vld [vmem:[#allocation5 + $0x5ec] ss:$16 sps:$4 sm:$0xff]  }
  0xf9   : > { %1956 = vmatpush2.bf16.msra.mxu1 %v3575_v12  ;;  %1984 = vmatprep.subr.bf16.mxu0 %v3586_v16  ;;  %v3668_v12 = vld [vmem:[#allocation5 + $0x408] ss:$16 sps:$4 sm:$0xff]  }
  0xfa   : > { %1957 = vmatprep.subr.bf16.mxu1 %v3583_v15  ;;  %v3676_v15 = vld [vmem:[#allocation5 + $0x6ec] ss:$16 sps:$4 sm:$0xff]   ;;  %v3671_v16 = vld [vmem:[#allocation5 + $0x5e8] ss:$16 sps:$4 sm:$0xff]  }
  0xfc   : > { %1985 = vmatpush1.bf16.msra.mxu0 %v3584_v18  ;;  %v3679_v18 = vld [vmem:[#allocation5 + $0x5cc] ss:$16 sps:$4 sm:$0xff]  }
  0xfd   : > { %1958 = vmatpush2.bf16.msra.mxu1 %v3581_v17  ;;  %1986 = vmatprep.subr.bf16.mxu0 %v3592_v20  ;;  %v3674_v17 = vld [vmem:[#allocation5 + $0x6e8] ss:$16 sps:$4 sm:$0xff]  }
  0xfe   : > { %1959 = vmatprep.subr.bf16.mxu1 %v3589_v19  ;;  %v3682_v19 = vld [vmem:[#allocation5 + $0x6cc] ss:$16 sps:$4 sm:$0xff]  }
  0xff   : > { %v3831_v20 = vld [vmem:[%s4242_s12 + $0x8] ss:$28 sps:$4 sm:$0xff]   ;;  %s3968_s12 = sshll.u32 %s4052_s28, 4  ;;  %s3969_s12 = int_to_ptr.vmem [resolvable:$false] %s3968_s12 }
 0x100   : > { %1987 = vmatpush1.bf16.msra.mxu0 %v3590_v22  ;;  %v3680_v22 = vld [vmem:[#allocation5 + $0x6c8] ss:$16 sps:$4 sm:$0xff]   ;;  %s3970_s30 = scalar_lea.vmem %s3969_s12, 512  ;;  %p3971_p3 = scmp.lt.s32.totalorder %s4312_s16, %s3969_s12 }
 0x101   : > { %1960 = vmatpush2.bf16.msra.mxu1 %v3587_v21  ;;  %1988 = vmatprep.subr.bf16.mxu0 %v3598_v24  ;;  %v3677_v21 = vld [vmem:[#allocation5 + $0x5c8] ss:$16 sps:$4 sm:$0xff]   ;;  %v3688_v24 = vld [vmem:[#allocation5 + $0x6ac] ss:$16 sps:$4 sm:$0xff]   ;;  %p3972_p9 = scmp.lt.s32.totalorder %s3970_s30, %s3964_s18 }
 0x102   : > { %1961 = vmatprep.subr.bf16.mxu1 %v3595_v23  ;;  %v3685_v23 = vld [vmem:[#allocation5 + $0x5ac] ss:$16 sps:$4 sm:$0xff]  }
 0x103   : > { %p3973_p13 = por %p3972_p9, %p3971_p3 }
 0x104   : > { %1989 = vmatpush1.bf16.msra.mxu0 %v3596_v26  ;;  %v3686_v26 = vld [vmem:[#allocation5 + $0x6a8] ss:$16 sps:$4 sm:$0xff]  }
 0x105   : > { %1962 = vmatpush2.bf16.msra.mxu1 %v3593_v25  ;;  %1990 = vmatprep.subr.bf16.mxu0 %v3604_v28  ;;  %v3683_v25 = vld [vmem:[#allocation5 + $0x5a8] ss:$16 sps:$4 sm:$0xff]   ;;  %v3694_v28 = vld [vmem:[#allocation5 + $0x68c] ss:$16 sps:$4 sm:$0xff]   ;;  %p3974_p5 = pnand %p3973_p13, %p3967_p6 }
 0x106   : > { %1963 = vmatprep.subr.bf16.mxu1 %v3601_v27  ;;  %v3691_v27 = vld [vmem:[#allocation5 + $0x58c] ss:$16 sps:$4 sm:$0xff]  }
 0x108   : > { %1991 = vmatpush1.bf16.msra.mxu0 %v3602_v51  ;;  %v3692_v51 = vld [vmem:[#allocation5 + $0x688] ss:$16 sps:$4 sm:$0xff]  }
 0x109   : > { %1964 = vmatpush2.bf16.msra.mxu1 %v3599_v29  ;;  %1992 = vmatprep.subr.bf16.mxu0 %v3610_v31  ;;  %v3689_v29 = vld [vmem:[#allocation5 + $0x588] ss:$16 sps:$4 sm:$0xff]   ;;  %v3700_v31 = vld [vmem:[#allocation5 + $0x66c] ss:$16 sps:$4 sm:$0xff]  }
 0x10a   : > { %1965 = vmatprep.subr.bf16.mxu1 %v3607_v30  ;;  %v3697_v30 = vld [vmem:[#allocation5 + $0x56c] ss:$16 sps:$4 sm:$0xff]  }
 0x10c   : > { %1993 = vmatpush1.bf16.msra.mxu0 %v3608_v33  ;;  %v3703_v33 = vld [vmem:[#allocation5 + $0x54c] ss:$16 sps:$4 sm:$0xff]  }
 0x10d   : > { %1966 = vmatpush2.bf16.msra.mxu1 %v3605_v32  ;;  %1994 = vmatprep.subr.bf16.mxu0 %v3616_v36  ;;  %v3695_v32 = vld [vmem:[#allocation5 + $0x568] ss:$16 sps:$4 sm:$0xff]  }
 0x10e   : > { %1967 = vmatprep.subr.bf16.mxu1 %v3613_v34  ;;  %v3706_v34 = vld [vmem:[#allocation5 + $0x64c] ss:$16 sps:$4 sm:$0xff]   ;;  %v3701_v36 = vld [vmem:[#allocation5 + $0x548] ss:$16 sps:$4 sm:$0xff]  }
 0x110   : > { %1995 = vmatpush1.bf16.msra.mxu0 %v3614_v38  ;;  %v3709_v38 = vld [vmem:[#allocation5 + $0x52c] ss:$16 sps:$4 sm:$0xff]  }
 0x111   : > { %1968 = vmatpush2.bf16.msra.mxu1 %v3611_v37  ;;  %1996 = vmatprep.subr.bf16.mxu0 %v3622_v40  ;;  %v3704_v37 = vld [vmem:[#allocation5 + $0x648] ss:$16 sps:$4 sm:$0xff]  }
 0x112   : > { %1969 = vmatprep.subr.bf16.mxu1 %v3619_v39  ;;  %v3712_v39 = vld [vmem:[#allocation5 + $0x62c] ss:$16 sps:$4 sm:$0xff]   ;;  %v3707_v40 = vld [vmem:[#allocation5 + $0x528] ss:$16 sps:$4 sm:$0xff]  }
 0x114   : > { %1997 = vmatpush1.bf16.msra.mxu0 %v3620_v43  ;;  %v3715_v43 = vld [vmem:[#allocation5 + $0x50c] ss:$16 sps:$4 sm:$0xff]  }
 0x115   : > { %1970 = vmatpush2.bf16.msra.mxu1 %v3617_v42  ;;  %1998 = vmatprep.subr.bf16.mxu0 %v3625_v44  ;;  %v3710_v42 = vld [vmem:[#allocation5 + $0x628] ss:$16 sps:$4 sm:$0xff]   ;;  %v3718_v44 = vld [vmem:[#allocation5 + $0x60c] ss:$16 sps:$4 sm:$0xff]  }
 0x116   : > { %2025 = vmatprep.subr.bf16.mxu1 %v3628_v45  ;;  %v3713_v45 = vld [vmem:[#allocation5 + $0x508] ss:$16 sps:$4 sm:$0xff]  }
 0x118   : > { %1972 = vmatmul.mubr.bf16.vlgmr.msra.gmra.mxu1 %v4265_v4  ;;  %1999 = vmatpush2.bf16.msra.mxu0 %v3623_v46  ;;  %v3644_v4 = vld [vmem:[#allocation5 + $0x488] ss:$16 sps:$4 sm:$0xff]  }
 0x119   : > { %2026 = vmatpush1.bf16.msra.mxu1 %v3626_v47  ;;  %2000 = vmatprep.subr.bf16.mxu0 %v3631_v48  ;;  %v3716_v46 = vld [vmem:[#allocation5 + $0x608] ss:$16 sps:$4 sm:$0xff]   ;;  %v3719_v48 = vld [vmem:[#allocation8 + $0x70] ss:$8 sps:$4 sm:$0xff]  }
 0x11a   : > { %2027 = vmatprep.subr.bf16.mxu1 %v3634_v50  ;;  %2057 = vmatprep.mubr.bf16.mxu1 %v4271_v35  ;;  %v3653_v35 = vld [vmem:[#allocation5 + $0x348] ss:$16 sps:$4 sm:$0xff]  }
 0x11b   : > { %v3721_v47 = vld [vmem:[#allocation8 + $0x74] ss:$8 sps:$4 sm:$0xff]   ;;  %v3724_v50 = vld [vmem:[#allocation8 + $0x64] ss:$8 sps:$4 sm:$0xff]  }
 0x11c   : > { %2001 = vmatpush2.bf16.msra.mxu0 %v3629_v52  ;;  %v3722_v52 = vld [vmem:[#allocation8 + $0x60] ss:$8 sps:$4 sm:$0xff]  }
 0x11d   : > { %2028 = vmatpush1.bf16.msra.mxu1 %v3632_v53  ;;  %2002 = vmatprep.subr.bf16.mxu0 %v3637_v54  ;;  %v3727_v53 = vld [vmem:[#allocation8 + $0x54] ss:$8 sps:$4 sm:$0xff]   ;;  %v3725_v54 = vld [vmem:[#allocation8 + $0x50] ss:$8 sps:$4 sm:$0xff]  }
 0x11e   : > { %2029 = vmatprep.subr.bf16.mxu1 %v3640_v55  ;;  %v3730_v55 = vld [vmem:[#allocation8 + $0x44] ss:$8 sps:$4 sm:$0xff]  }
 0x120   : > { %2003 = vmatpush2.bf16.msra.mxu0 %v3635_v56  ;;  %v3767_v56 = vld [vmem:[#allocation8 + $0x170] ss:$8 sps:$4 sm:$0xff]  }
 0x121   : > { %2030 = vmatpush1.bf16.msra.mxu1 %v3638_v57  ;;  %2004 = vmatprep.subr.bf16.mxu0 %v3643_v58  ;;  %v3769_v57 = vld [vmem:[#allocation8 + $0x174] ss:$8 sps:$4 sm:$0xff]   ;;  %v3772_v58 = vld [vmem:[#allocation8 + $0x164] ss:$8 sps:$4 sm:$0xff]  }
 0x122   : > { %2031 = vmatprep.subr.bf16.mxu1 %v3646_v59  ;;  %v3728_v59 = vld [vmem:[#allocation8 + $0x40] ss:$8 sps:$4 sm:$0xff]  }
 0x124   : > { %2005 = vmatpush2.bf16.msra.mxu0 %v3641_v49  ;;  %v3733_v49 = vld [vmem:[#allocation8 + $0x34] ss:$8 sps:$4 sm:$0xff]  }
 0x125   : > { %2032 = vmatpush1.bf16.msra.mxu1 %v3644_v4  ;;  %2006 = vmatprep.subr.bf16.mxu0 %v3649_v60  ;;  %v3731_v4 = vld [vmem:[#allocation8 + $0x30] ss:$8 sps:$4 sm:$0xff]   ;;  %v3736_v60 = vld [vmem:[#allocation8 + $0x24] ss:$8 sps:$4 sm:$0xff]  }
 0x126   : > { %2033 = vmatprep.subr.bf16.mxu1 %v3652_v61  ;;  %v3773_v61 = vld [vmem:[#allocation8 + $0x150] ss:$8 sps:$4 sm:$0xff]  }
 0x128   : > { %2007 = vmatpush2.bf16.msra.mxu0 %v3647_v62  ;;  %v3778_v62 = vld [vmem:[#allocation8 + $0x144] ss:$8 sps:$4 sm:$0xff]  }
 0x129   : > { %2034 = vmatpush1.bf16.msra.mxu1 %v3650_v63  ;;  %2008 = vmatprep.subr.bf16.mxu0 %v3655_v0  ;;  %v3734_v63 = vld [vmem:[#allocation8 + $0x20] ss:$8 sps:$4 sm:$0xff]   ;;  %v3739_v0 = vld [vmem:[#allocation8 + $0x14] ss:$8 sps:$4 sm:$0xff]  }
 0x12a   : > { %2035 = vmatprep.subr.bf16.mxu1 %v3658_v1  ;;  %v3776_v1 = vld [vmem:[#allocation8 + $0x140] ss:$8 sps:$4 sm:$0xff]  }
 0x12c   : > { %2009 = vmatpush2.bf16.msra.mxu0 %v3653_v35  ;;  %v3737_v35 = vld [vmem:[#allocation8 + $0x10] ss:$8 sps:$4 sm:$0xff]  }
 0x12d   : > { %2036 = vmatpush1.bf16.msra.mxu1 %v3656_v2  ;;  %2010 = vmatprep.subr.bf16.mxu0 %v3661_v3  ;;  %v3742_v2 = vld [vmem:[#allocation8 + $0x4] ss:$8 sps:$4 sm:$0xff]   ;;  %v3740_v3 = vld [vmem:[#allocation8] ss:$8 sps:$4 sm:$0xff]  }
 0x12e   : > { %2037 = vmatprep.subr.bf16.mxu1 %v3664_v5  ;;  %v3745_v5 = vld [vmem:[#allocation8 + $0xf4] ss:$8 sps:$4 sm:$0xff]  }
 0x130   : > { %2011 = vmatpush2.bf16.msra.mxu0 %v3659_v6  ;;  %v3743_v6 = vld [vmem:[#allocation8 + $0xf0] ss:$8 sps:$4 sm:$0xff]  }
 0x131   : > { %2038 = vmatpush1.bf16.msra.mxu1 %v3662_v7  ;;  %2012 = vmatprep.subr.bf16.mxu0 %v3667_v8  ;;  %v3748_v7 = vld [vmem:[#allocation8 + $0xe4] ss:$8 sps:$4 sm:$0xff]   ;;  %v3781_v8 = vld [vmem:[#allocation8 + $0x134] ss:$8 sps:$4 sm:$0xff]  }
 0x132   : > { %2039 = vmatprep.subr.bf16.mxu1 %v3670_v9  ;;  %v3779_v9 = vld [vmem:[#allocation8 + $0x130] ss:$8 sps:$4 sm:$0xff]  }
 0x134   : > { %2013 = vmatpush2.bf16.msra.mxu0 %v3665_v10  ;;  %v3746_v10 = vld [vmem:[#allocation8 + $0xe0] ss:$8 sps:$4 sm:$0xff]  }
 0x135   : > { %2040 = vmatpush1.bf16.msra.mxu1 %v3668_v12  ;;  %2068 = vmatprep.subr.bf16.mxu0 %v3676_v15  ;;  %v3751_v12 = vld [vmem:[#allocation8 + $0xd4] ss:$8 sps:$4 sm:$0xff]   ;;  %v3782_v15 = vld [vmem:[#allocation8 + $0x120] ss:$8 sps:$4 sm:$0xff]  }
 0x136   : > { %2041 = vmatprep.subr.bf16.mxu1 %v3673_v13  ;;  %v3784_v13 = vld [vmem:[#allocation8 + $0x124] ss:$8 sps:$4 sm:$0xff]  }
 0x137   : > { %2015 = vmatmul.mubr.bf16.vlgmr.msra.gmra.mxu0 %v3831_v20  ;;  %v3790_v20 = vld [vmem:[#allocation8 + $0x104] ss:$8 sps:$4 sm:$0xff]  }
 0x138   : > { %2069 = vmatpush1.bf16.msra.mxu0 %v3674_v17  ;;  %2100 = vmatprep.mubr.bf16.mxu0 %v4051_v14  ;;  %v3698_v14 = vld [vmem:[#allocation5 + $0x668] ss:$16 sps:$4 sm:$0xff]  }
 0x139   : > { %2042 = vmatpush2.bf16.msra.mxu1 %v3671_v16  ;;  %2070 = vmatprep.subr.bf16.mxu0 %v3682_v19  ;;  %v3749_v16 = vld [vmem:[#allocation8 + $0xd0] ss:$8 sps:$4 sm:$0xff]   ;;  %v3754_v17 = vld [vmem:[#allocation8 + $0xc4] ss:$8 sps:$4 sm:$0xff]  }
 0x13a   : > { %2043 = vmatprep.subr.bf16.mxu1 %v3679_v18  ;;  %v3787_v18 = vld [vmem:[#allocation8 + $0x114] ss:$8 sps:$4 sm:$0xff]   ;;  %v3785_v19 = vld [vmem:[#allocation8 + $0x110] ss:$8 sps:$4 sm:$0xff]  }
 0x13c   : > { %2071 = vmatpush1.bf16.msra.mxu0 %v3680_v22  ;;  %v3788_v22 = vld [vmem:[#allocation8 + $0x100] ss:$8 sps:$4 sm:$0xff]  }
 0x13d   : > { %2044 = vmatpush2.bf16.msra.mxu1 %v3677_v21  ;;  %2072 = vmatprep.subr.bf16.mxu0 %v3688_v24  ;;  %v3752_v21 = vld [vmem:[#allocation8 + $0xc0] ss:$8 sps:$4 sm:$0xff]   ;;  %v3793_v24 = vld [vmem:[#allocation8 + $0x1f4] ss:$8 sps:$4 sm:$0xff]  }
 0x13e   : > { %2045 = vmatprep.subr.bf16.mxu1 %v3685_v23  ;;  %v3757_v23 = vld [vmem:[#allocation8 + $0xb4] ss:$8 sps:$4 sm:$0xff]  }
 0x140   : > { %2073 = vmatpush1.bf16.msra.mxu0 %v3686_v26  ;;  %v3791_v26 = vld [vmem:[#allocation8 + $0x1f0] ss:$8 sps:$4 sm:$0xff]  }
 0x141   : > { %2046 = vmatpush2.bf16.msra.mxu1 %v3683_v25  ;;  %2074 = vmatprep.subr.bf16.mxu0 %v3694_v28  ;;  %v3755_v25 = vld [vmem:[#allocation8 + $0xb0] ss:$8 sps:$4 sm:$0xff]   ;;  %v3796_v28 = vld [vmem:[#allocation8 + $0x1e4] ss:$8 sps:$4 sm:$0xff]  }
 0x142   : > { %2047 = vmatprep.subr.bf16.mxu1 %v3691_v27  ;;  %v3760_v27 = vld [vmem:[#allocation8 + $0xa4] ss:$8 sps:$4 sm:$0xff]  }
 0x144   : > { %2075 = vmatpush1.bf16.msra.mxu0 %v3692_v51  ;;  %v3794_v51 = vld [vmem:[#allocation8 + $0x1e0] ss:$8 sps:$4 sm:$0xff]  }
 0x145   : > { %2048 = vmatpush2.bf16.msra.mxu1 %v3689_v29  ;;  %2076 = vmatprep.subr.bf16.mxu0 %v3700_v31  ;;  %v3758_v29 = vld [vmem:[#allocation8 + $0xa0] ss:$8 sps:$4 sm:$0xff]   ;;  %v3799_v31 = vld [vmem:[#allocation8 + $0x1d4] ss:$8 sps:$4 sm:$0xff]  }
 0x146   : > { %2049 = vmatprep.subr.bf16.mxu1 %v3697_v30  ;;  %v3763_v30 = vld [vmem:[#allocation8 + $0x94] ss:$8 sps:$4 sm:$0xff]  }
 0x148   : > { %2077 = vmatpush1.bf16.msra.mxu0 %v3698_v14  ;;  %v3797_v14 = vld [vmem:[#allocation8 + $0x1d0] ss:$8 sps:$4 sm:$0xff]  }
 0x149   : > { %2050 = vmatpush2.bf16.msra.mxu1 %v3695_v32  ;;  %2078 = vmatprep.subr.bf16.mxu0 %v3706_v34  ;;  %v3761_v32 = vld [vmem:[#allocation8 + $0x90] ss:$8 sps:$4 sm:$0xff]   ;;  %v3802_v34 = vld [vmem:[#allocation8 + $0x1c4] ss:$8 sps:$4 sm:$0xff]  }
 0x14a   : > { %2051 = vmatprep.subr.bf16.mxu1 %v3703_v33  ;;  %v3766_v33 = vld [vmem:[#allocation8 + $0x84] ss:$8 sps:$4 sm:$0xff]  }
 0x14c   : > { %2079 = vmatpush1.bf16.msra.mxu0 %v3704_v37  ;;  %v3800_v37 = vld [vmem:[#allocation8 + $0x1c0] ss:$8 sps:$4 sm:$0xff]  }
 0x14d   : > { %2052 = vmatpush2.bf16.msra.mxu1 %v3701_v36  ;;  %2080 = vmatprep.subr.bf16.mxu0 %v3712_v39  ;;  %v3764_v36 = vld [vmem:[#allocation8 + $0x80] ss:$8 sps:$4 sm:$0xff]   ;;  %v3803_v39 = vld [vmem:[#allocation8 + $0x1b0] ss:$8 sps:$4 sm:$0xff]  }
 0x14e   : > { %2053 = vmatprep.subr.bf16.mxu1 %v3709_v38  ;;  %v3805_v38 = vld [vmem:[#allocation8 + $0x1b4] ss:$8 sps:$4 sm:$0xff]  }
 0x150   : > { %2081 = vmatpush1.bf16.msra.mxu0 %v3710_v42  ;;  %v3806_v42 = vld [vmem:[#allocation8 + $0x1a0] ss:$8 sps:$4 sm:$0xff]  }
 0x151   : > { %2054 = vmatpush2.bf16.msra.mxu1 %v3707_v40  ;;  %2082 = vmatprep.subr.bf16.mxu0 %v3718_v44  ;;  %v3808_v40 = vld [vmem:[#allocation8 + $0x1a4] ss:$8 sps:$4 sm:$0xff]   ;;  %v3809_v44 = vld [vmem:[#allocation8 + $0x190] ss:$8 sps:$4 sm:$0xff]  }
 0x152   : > { %2055 = vmatprep.subr.bf16.mxu1 %v3715_v43  ;;  %v3811_v43 = vld [vmem:[#allocation8 + $0x194] ss:$8 sps:$4 sm:$0xff]  }
 0x154   : > { %2083 = vmatpush1.bf16.msra.mxu0 %v3716_v46  ;;  %v3812_v46 = vld [vmem:[#allocation8 + $0x180] ss:$8 sps:$4 sm:$0xff]  }
 0x155   : > { %2056 = vmatpush2.bf16.msra.mxu1 %v3713_v45  ;;  %2519 = vmatprep.subr.bf16.mxu0 %v3721_v47  ;;  %v3814_v45 = vld [vmem:[#allocation8 + $0x184] ss:$8 sps:$4 sm:$0xff]   ;;  %v591_v47 = vlaneseq }
 0x156   : > { %2562 = vmatprep.subr.bf16.mxu1 %v3769_v57 }
 0x157   : > { %2101 = vmatmul.mubr.bf16.vlgmr.msra.gmra.mxu0 %v4275_v41  ;;  %v3775_v41 = vld [vmem:[#allocation8 + $0x154] ss:$8 sps:$4 sm:$0xff]  }
 0x158   : > { %2058 = vmatmul.mubr.bf16.vlgmr.msra.gmra.mxu1 %v4280_v11  ;;  %2520 = vmatpush1.bf16.msra.mxu0 %v3719_v48  ;;  %v3770_v11 = vld [vmem:[#allocation8 + $0x160] ss:$8 sps:$4 sm:$0xff]  }
 0x159   : > { %2521 = vmatprep.subr.bf16.mxu0 %v3724_v50  ;;  %2563 = vmatpush1.bf16.msra.mxu1 %v3767_v56  ;;  %v4290_v50 = vshrl.u32 %v591_v47, 7  ;;  %v3821_v47 = vld [vmem:[#allocation10 + $0x60] sm:$0xff]  }
 0x15a   : > { %2564 = vmatprep.subr.bf16.mxu1 %v3772_v58  ;;  %v589_v58 = vld [vmem:[#allocation7] sm:$0xf] }
 0x15c   : > { %2522 = vmatpush1.bf16.msra.mxu0 %v3722_v52 }
 0x15d   : > { %2523 = vmatprep.subr.bf16.mxu0 %v3727_v53  ;;  %2565 = vmatpush1.bf16.msra.mxu1 %v3770_v11 }
 0x15e   : > { %2566 = vmatprep.subr.bf16.mxu1 %v3775_v41 }
 0x160   : > { %2524 = vmatpush1.bf16.msra.mxu0 %v3725_v54  ;;  %v597_v54 = vsub.s32 1, %v4290_v50 }
 0x161   : > { %2525 = vmatprep.subr.bf16.mxu0 %v3730_v55  ;;  %2567 = vmatpush1.bf16.msra.mxu1 %v3773_v61  ;;  %v593_v55 = vsub.s32 0, %v4290_v50 }
 0x162   : > { %2568 = vmatprep.subr.bf16.mxu1 %v3778_v62 }
 0x164   : > { %2526 = vmatpush1.bf16.msra.mxu0 %v3728_v59  ;;  %v598_v59 = vrot.slane %v589_v58, %v597_v54 }
 0x165   : > { %2527 = vmatprep.subr.bf16.mxu0 %v3733_v49  ;;  %2569 = vmatpush1.bf16.msra.mxu1 %v3776_v1  ;;  %v594_v49 = vrot.slane %v589_v58, %v593_v55 }
 0x166   : > { %2570 = vmatprep.subr.bf16.mxu1 %v3781_v8 }
 0x168   : > { %2528 = vmatpush1.bf16.msra.mxu0 %v3731_v4 }
 0x169   : > { %2529 = vmatprep.subr.bf16.mxu0 %v3736_v60  ;;  %2571 = vmatpush1.bf16.msra.mxu1 %v3779_v9 }
 0x16a   : > { %2572 = vmatprep.subr.bf16.mxu1 %v3784_v13 }
 0x16c   : > { %2530 = vmatpush1.bf16.msra.mxu0 %v3734_v63 }
 0x16d   : > { %2531 = vmatprep.subr.bf16.mxu0 %v3739_v0  ;;  %2573 = vmatpush1.bf16.msra.mxu1 %v3782_v15 }
 0x16e   : > { %2574 = vmatprep.subr.bf16.mxu1 %v3787_v18 }
 0x170   : > { %2532 = vmatpush1.bf16.msra.mxu0 %v3737_v35 }
 0x171   : > { %2533 = vmatprep.subr.bf16.mxu0 %v3742_v2  ;;  %2575 = vmatpush1.bf16.msra.mxu1 %v3785_v19 }
 0x172   : > { %2576 = vmatprep.subr.bf16.mxu1 %v3790_v20 }
 0x174   : > { %2534 = vmatpush1.bf16.msra.mxu0 %v3740_v3 }
 0x175   : > { %2535 = vmatprep.subr.bf16.mxu0 %v3745_v5  ;;  %2577 = vmatpush1.bf16.msra.mxu1 %v3788_v22 }
 0x176   : > { %2578 = vmatprep.subr.bf16.mxu1 %v3793_v24 }
 0x177   : > { %v1801_v52 = vpop.f32.mrf.mxu0 }
 0x178   : > { %2536 = vmatpush2.bf16.msra.mxu0 %v3743_v6  ;;  %v1844_v48 = vpop.f32.mrf.mxu1  ;;  %v1802_v61 = vadd.f32 %v1801_v52, %v594_v49 }
 0x179   : > { %2537 = vmatprep.subr.bf16.mxu0 %v3748_v7  ;;  %2579 = vmatpush2.bf16.msra.mxu1 %v3791_v26  ;;  %v1803_v56 = vpop.f32.mrf.mxu0 }
 0x17a   : > { %2580 = vmatprep.subr.bf16.mxu1 %v3796_v28  ;;  %v1846_v53 = vpop.f32.mrf.mxu1  ;;  %v1804_v60 = vadd.f32 %v1803_v56, %v598_v59  ;;  %v1845_v3 = vadd.f32 %v1844_v48, %v1802_v61  ;;  %v3823_v61 = vld [vmem:[#allocation10 + $0x58] sm:$0xff]  }
 0x17b   : > { %v1805_v11 = vpop.f32.mrf.mxu0 }
 0x17c   : > { %2538 = vmatpush2.bf16.msra.mxu0 %v3746_v10  ;;  %v1848_v57 = vpop.f32.mrf.mxu1  ;;  %v1806_v63 = vadd.f32 %v1805_v11, %v594_v49  ;;  %v1847_v35 = vadd.f32 %v1846_v53, %v1804_v60 }
 0x17d   : > { %2539 = vmatprep.subr.bf16.mxu0 %v3751_v12  ;;  %2581 = vmatpush2.bf16.msra.mxu1 %v3794_v51  ;;  %v1807_v62 = vpop.f32.mrf.mxu0 }
 0x17e   : > { %2582 = vmatprep.subr.bf16.mxu1 %v3799_v31  ;;  %v1850_v41 = vpop.f32.mrf.mxu1  ;;  %v1808_v2 = vadd.f32 %v1807_v62, %v598_v59  ;;  %v1849_v6 = vadd.f32 %v1848_v57, %v1806_v63  ;;  %v605_v31 = vsub.s32 3, %v4290_v50 }
 0x180   : > { %2540 = vmatpush2.bf16.msra.mxu0 %v3749_v16  ;;  %v1851_v12 = vadd.f32 %v1850_v41, %v1808_v2  ;;  %v3822_v41 = vld [vmem:[#allocation10 + $0x20] sm:$0xff]  }
 0x181   : > { %2541 = vmatprep.subr.bf16.mxu0 %v3754_v17  ;;  %2583 = vmatpush2.bf16.msra.mxu1 %v3797_v14  ;;  %v3816_v14 = vld [vmem:[#allocation10 + $0x38] sm:$0xff]  }
 0x182   : > { %2584 = vmatprep.subr.bf16.mxu1 %v3802_v34  ;;  %v601_v34 = vsub.s32 2, %v4290_v50 }
 0x184   : > { %2542 = vmatpush2.bf16.msra.mxu0 %v3752_v21 }
 0x185   : > { %2543 = vmatprep.subr.bf16.mxu0 %v3757_v23  ;;  %2585 = vmatpush2.bf16.msra.mxu1 %v3800_v37 }
 0x186   : > { %2586 = vmatprep.subr.bf16.mxu1 %v3805_v38  ;;  %v3818_v38 = vld [vmem:[#allocation10 + $0x30] sm:$0xff]  }
 0x188   : > { %2544 = vmatpush2.bf16.msra.mxu0 %v3755_v25 }
 0x189   : > { %2545 = vmatprep.subr.bf16.mxu0 %v3760_v27  ;;  %2587 = vmatpush2.bf16.msra.mxu1 %v3803_v39  ;;  %v606_v39 = vrot.slane %v589_v58, %v605_v31 }
 0x18a   : > { %2588 = vmatprep.subr.bf16.mxu1 %v3808_v40  ;;  %v3819_v40 = vld [vmem:[#allocation10 + $0x68] sm:$0xff]  }
 0x18c   : > { %2546 = vmatpush2.bf16.msra.mxu0 %v3758_v29 }
 0x18d   : > { %2547 = vmatprep.subr.bf16.mxu0 %v3763_v30  ;;  %2589 = vmatpush2.bf16.msra.mxu1 %v3806_v42  ;;  %v602_v42 = vrot.slane %v589_v58, %v601_v34 }
 0x18e   : > { %2590 = vmatprep.subr.bf16.mxu1 %v3811_v43 }
 0x190   : > { %2548 = vmatpush2.bf16.msra.mxu0 %v3761_v32  ;;  %v3815_v32 = vld [vmem:[#allocation10 + $0x78] sm:$0xff]  }
 0x191   : > { %2549 = vmatprep.subr.bf16.mxu0 %v3766_v33  ;;  %2591 = vmatpush2.bf16.msra.mxu1 %v3809_v44  ;;  %v3817_v33 = vld [vmem:[#allocation10 + $0x70] sm:$0xff]  }
 0x192   : > { %2592 = vmatprep.subr.bf16.mxu1 %v3814_v45  ;;  %v3820_v45 = vld [vmem:[#allocation10 + $0x28] sm:$0xff]  }
 0x194   : > { %2550 = vmatpush2.bf16.msra.mxu0 %v3764_v36 }
 0x195   : > { %2593 = vmatpush2.bf16.msra.mxu1 %v3812_v46  ;;  %3250 = vmatprep.subr.bf16.mxu0 %v3815_v32 }
 0x198   : > { %v1930_v4 = vpop.f32.mrf.mxu1 }
 0x19a   : > { %v1932_v0 = vpop.f32.mrf.mxu1 }
 0x19c   : > { %v1934_v8 = vpop.f32.mrf.mxu1 }
 0x19e   : > { %v1936_v19 = vpop.f32.mrf.mxu1 }
 0x1b7   : > { %v1887_v1 = vpop.f32.mrf.mxu0 }
 0x1b8   : > { %v1888_v9 = vadd.f32 %v1887_v1, %v1845_v3  ;;  %v3824_v3 = vld [vmem:[#allocation10 + $0x18] sm:$0xff]  }
 0x1b9   : > { %v1889_v5 = vpop.f32.mrf.mxu0 }
 0x1ba   : > { %v1890_v7 = vadd.f32 %v1889_v5, %v1847_v35  ;;  %v1931_v20 = vadd.f32 %v1930_v4, %v1888_v9 }
 0x1bb   : > { %v1891_v10 = vpop.f32.mrf.mxu0 }
 0x1bc   : > { %v1892_v13 = vadd.f32 %v1891_v10, %v1849_v6  ;;  %v1933_v16 = vadd.f32 %v1932_v0, %v1890_v7  ;;  %v2111_v25 = vmax.f32 %v1931_v20, 0.0  ;;  %v3826_v20 = vld [vmem:[#allocation10 + $0x10] sm:$0xff]  }
 0x1bd   : > { %v1893_v15 = vpop.f32.mrf.mxu0 }
 0x1be   : > { %v1935_v17 = vadd.f32 %v1934_v8, %v1892_v13  ;;  %v1894_v18 = vadd.f32 %v1893_v15, %v1851_v12  ;;  %v2112_v23 = vmax.f32 %v1933_v16, 0.0 }
 0x1c0   : > { %v1937_v21 = vadd.f32 %v1936_v19, %v1894_v18  ;;  %v2115_v22 = vmax.f32 %v1935_v17, 0.0  ;;  %v3825_v19 = vld [vmem:[#allocation10 + $0x50] sm:$0xff]  }
 0x1c2   : > { %v2116_v24 = vmax.f32 %v1937_v21, 0.0  ;;  %v2119_v27 = vpack.c.bf16 %v2115_v22, %v2111_v25  ;;  %v3827_v21 = vld [vmem:[#allocation10 + $0x48] sm:$0xff]  }
 0x1c3   : > { %v3828_v22 = vld [vmem:[#allocation10 + $0x8] sm:$0xff]  }
 0x1c4   : > { %v2120_v26 = vpack.c.bf16 %v2116_v24, %v2112_v23  ;;  %v3829_v23 = vld [vmem:[#allocation10 + $0x40] sm:$0xff]  }
 0x1c5   : > { %v3830_v24 = vld [vmem:[#allocation10] sm:$0xff]  }
 0x1c6   : > { %2551 = vmatprep.mubr.bf16.mxu0 %v2120_v26 }
 0x1c7   : > { %2552 = vmatmul.mubr.bf16.vlgmr.msra.gmra.mxu0 %v2119_v27  ;;  %v2187_v27 = vld [vmem:[%s4364_s4] sm:$0x3] }
 0x1c8   : > { %3251 = vmatpush3.bf16.msra.mxu0 %v3816_v14 }
 0x1c9   : > { %3252 = vmatprep.subr.bf16.mxu0 %v3817_v33 }
 0x1cc   : > { %3253 = vmatpush3.bf16.msra.mxu0 %v3818_v38 }
 0x1cd   : > { %3254 = vmatprep.subr.bf16.mxu0 %v3819_v40 }
 0x1d0   : > { %3255 = vmatpush3.bf16.msra.mxu0 %v3820_v45 }
 0x1d1   : > { %3256 = vmatprep.subr.bf16.mxu0 %v3821_v47 }
 0x1d4   : > { %3257 = vmatpush3.bf16.msra.mxu0 %v3822_v41 }
 0x1d5   : > { %3258 = vmatprep.subr.bf16.mxu0 %v3823_v61 }
 0x1d8   : > { %v1973_v28 = vpop.f32.mrf.mxu1  ;;  %3259 = vmatpush3.bf16.msra.mxu0 %v3824_v3 }
 0x1d9   : > { %v1974_v48 = vadd.f32 %v1973_v28, %v602_v42  ;;  %3260 = vmatprep.subr.bf16.mxu0 %v3825_v19 }
 0x1da   : > { %v1975_v51 = vpop.f32.mrf.mxu1 }
 0x1db   : > { %v1976_v46 = vadd.f32 %v1975_v51, %v606_v39  ;;  %v2192_v51 = vrot.slane %v2187_v27, %v593_v55 }
 0x1dc   : > { %v1977_v36 = vpop.f32.mrf.mxu1  ;;  %3261 = vmatpush3.bf16.msra.mxu0 %v3826_v20 }
 0x1dd   : > { %v1978_v56 = vadd.f32 %v1977_v36, %v602_v42  ;;  %3262 = vmatprep.subr.bf16.mxu0 %v3827_v21 }
 0x1de   : > { %v1979_v43 = vpop.f32.mrf.mxu1 }
 0x1df   : > { %v1980_v4 = vadd.f32 %v1979_v43, %v606_v39 }
 0x1e0   : > { %3263 = vmatpush3.bf16.msra.mxu0 %v3828_v22 }
 0x1e1   : > { %3264 = vmatprep.subr.bf16.mxu0 %v3829_v23 }
 0x1e4   : > { %3265 = vmatpush3.bf16.msra.mxu0 %v3830_v24 }
 0x1f7   : > { %v2016_v29 = vpop.f32.mrf.mxu0 }
 0x1f8   : > { %v2017_v59 = vadd.f32 %v2016_v29, %v1974_v48  ;;  %v2196_v29 = vrot.slane %v2187_v27, %v597_v54  ;;  %v3227_v48 = vld [vmem:[%s4366_s6] ss:$0 sm:$0xff] }
 0x1f9   : > { %v2018_v30 = vpop.f32.mrf.mxu0 }
 0x1fa   : > { %v2019_v57 = vadd.f32 %v2018_v30, %v1976_v46 }
 0x1fb   : > { %v2020_v37 = vpop.f32.mrf.mxu0 }
 0x1fc   : > { %v2021_v60 = vadd.f32 %v2020_v37, %v1978_v56 }
 0x1fd   : > { %v2022_v44 = vpop.f32.mrf.mxu0 }
 0x1fe   : > { %v2023_v1 = vadd.f32 %v2022_v44, %v1980_v4 }
 0x217   : > { %v2102_v53 = vpop.f32.mrf.mxu0 }
 0x218   : > { %v2059_v52 = vpop.f32.mrf.mxu1 }
 0x219   : > { %v2104_v11 = vpop.f32.mrf.mxu0  ;;  %v2060_v62 = vadd.f32 %v2059_v52, %v2017_v59 }
 0x21a   : > { %v2061_v49 = vpop.f32.mrf.mxu1 }
 0x21b   : > { %v2062_v58 = vadd.f32 %v2061_v49, %v2019_v57  ;;  %v2106_v0 = vpop.f32.mrf.mxu0  ;;  %v2103_v8 = vadd.f32 %v2102_v53, %v2060_v62 }
 0x21c   : > { %v2063_v63 = vpop.f32.mrf.mxu1 }
 0x21d   : > { %v2064_v35 = vadd.f32 %v2063_v63, %v2021_v60  ;;  %v2105_v5 = vadd.f32 %v2104_v11, %v2062_v58  ;;  %v2108_v9 = vpop.f32.mrf.mxu0  ;;  %v2113_v16 = vmax.f32 %v2103_v8, 0.0 }
 0x21e   : > { %v2065_v2 = vpop.f32.mrf.mxu1 }
 0x21f   : > { %v2107_v6 = vadd.f32 %v2106_v0, %v2064_v35  ;;  %v2066_v7 = vadd.f32 %v2065_v2, %v2023_v1  ;;  %v2114_v13 = vmax.f32 %v2105_v5, 0.0 }
 0x221   : > { %v2109_v10 = vadd.f32 %v2108_v9, %v2066_v7  ;;  %v2117_v12 = vmax.f32 %v2107_v6, 0.0 }
 0x223   : > { %v2118_v15 = vmax.f32 %v2109_v10, 0.0  ;;  %v2121_v18 = vpack.c.bf16 %v2117_v12, %v2113_v16 }
 0x225   : > { %v2122_v17 = vpack.c.bf16 %v2118_v15, %v2114_v13 }
 0x227   : > { %2594 = vmatprep.mubr.bf16.mxu1 %v2122_v17 }
 0x228   : > { %2595 = vmatmul.mubr.bf16.vlgmr.msra.gmra.mxu1 %v2121_v18 }
 0x287   : > { %v2553_v25 = vpop.f32.mrf.mxu0 }
 0x288   : > { %v2554_v34 = vadd.f32 %v2553_v25, %v2192_v51 }
 0x289   : > { %v2555_v26 = vpop.f32.mrf.mxu0 }
 0x28a   : > { %v2556_v14 = vadd.f32 %v2555_v26, %v2196_v29 }
 0x28b   : > { %v2557_v28 = vpop.f32.mrf.mxu0 }
 0x28c   : > { %v2558_v33 = vadd.f32 %v2557_v28, %v2192_v51 }
 0x28d   : > { %v2559_v31 = vpop.f32.mrf.mxu0 }
 0x28e   : > { %v2560_v37 = vadd.f32 %v2559_v31, %v2196_v29 }
 0x2e8   : > { %v2596_v30 = vpop.f32.mrf.mxu1 }
 0x2e9   : > { %v2597_v40 = vadd.f32 %v2596_v30, %v2554_v34 }
 0x2ea   : > { %v2598_v32 = vpop.f32.mrf.mxu1 }
 0x2eb   : > { %v2599_v38 = vadd.f32 %v2598_v32, %v2556_v14  ;;  %v2605_v46 = vmax.f32 %v2597_v40, 0.0 }
 0x2ec   : > { %v2600_v36 = vpop.f32.mrf.mxu1 }
 0x2ed   : > { %v2601_v39 = vadd.f32 %v2600_v36, %v2558_v33  ;;  %v2606_v45 = vmax.f32 %v2599_v38, 0.0 }
 0x2ee   : > { %v2602_v42 = vpop.f32.mrf.mxu1 }
 0x2ef   : > { %v2603_v43 = vadd.f32 %v2602_v42, %v2560_v37  ;;  %v2607_v44 = vmax.f32 %v2601_v39, 0.0 }
 0x2f1   : > { %v2608_v54 = vmax.f32 %v2603_v43, 0.0  ;;  %v2609_v55 = vpack.c.bf16 %v2607_v44, %v2605_v46 }
 0x2f3   : > { %v2610_v50 = vpack.c.bf16 %v2608_v54, %v2606_v45 }
 0x2f5   : > { %2778 = vmatprep.mubr.bf16.mxu0 %v2610_v50 }
 0x2f6   : > { %2779 = vmatmul.mubr.bf16.vlgmr.msra.gmra.mxu0 %v2609_v55 }
 0x3b6   : > { %v3266_v47 = vpop.f32.mrf.mxu0 }
 0x3b8   : > { %v3267_v52 = vpop.f32.mrf.mxu0 }
 0x3b9   : > { %v3268_v53 = vadd.f32 %v3267_v52, %v3266_v47 }
 0x3ba   : > { %v3269_v56 = vpop.f32.mrf.mxu0 }
 0x3bb   : > { %v2781_v57 = vadd.f32 %v3268_v53, %v3227_v48 }
 0x3bc   : > { %v3270_v59 = vpop.f32.mrf.mxu0 }
 0x3bd   : > { %v2787_v49 = vmax.f32 %v2781_v57, 0.0  ;;  %v3271_v11 = vadd.f32 %v3270_v59, %v3269_v56 }
 0x3bf   : > { %2789 = vst [vmem:[%s353_s22] sm:$0xff] %v2787_v49  ;;  %v2784_v41 = vadd.f32 %v3271_v11, %v3227_v48 }
 0x3c1   : > { %v2788_v4 = vmax.f32 %v2784_v41, 0.0 }
 0x3c3   : > { %2790 = vst [vmem:[%s353_s22 + $0x8] sm:$0xff] %v2788_v4 }
 0x3c4   : > { %3977 = shalt.err (!%p3974_p5)
}
 0x3c5   : > { %s3978_s9 = scalar_lea.hbm %s4317_s29, 256  ;;  %s3982_s21 = scalar_lea.hbm %s4367_s7, 512 }
 0x3c6   : > { %p3979_p0 = scmp.ne.s32.totalorder %s4317_s29, %s3978_s9  ;;  %p3983_p10 = scmp.lt.s32.totalorder %s4317_s29, %s4367_s7 }
 0x3c7   : > { %p3984_p1 = scmp.lt.s32.totalorder %s3982_s21, %s3978_s9 }
 0x3c8   : > { %p3980_p7 = pnand %p3979_p0, %p4387_p8 }
 0x3c9   : > { %p3985_p2 = por %p3984_p1, %p3983_p10 }
 0x3ca   : > { %p3981_p11 = pneg %p3980_p7 }
 0x3cc   : > { %p3986_p4 = pnand %p3985_p2, %p3981_p11 }
 0x3ce   : > { %3989 = shalt.err (!%p3986_p4)
}
 0x3cf   : > { %s4053_s10 = smov 128   ;;  %s4054_s1 = smov 8  }
 0x3d0   : > { %3293 = dma.vmem_to_hbm [thread:$0]  (%p4387_p8), %s4312_s16, 256, %s4317_s29, %s2792_s15, %s4053_s10, %s4053_s10, %s4054_s1  }
 0x3d1 PF: > { %s2820_s18 = sand.u32 1, %s4024_s24   ;;  %p4388_p12 = scmp.ne.s32.totalorder %s4374_s8, 0 }
 0x3d2   : > { %p4389_p6 = scmp.ge.s32.totalorder %s4036_s27, 2  ;;  %s2821_s28 = scalar_lea.sflag [#allocation4], %s2820_s18 }
 0x3d4   : > { %p3313_p3 = pnand %p4389_p6, %p4388_p12 }
 0x3d6   : > { %p3314_p9 = pneg %p3313_p3 }
 0x3d8   : > { %4019 = dma.done.wait (%p3314_p9), %s2821_s28, 256  }
 0x3d9   : > { %4021 = vsyncadd (%p3314_p9), %s2821_s28, 4294967040  ;;  %p22_p13 = scmp.ge.s32.totalorder %s4183_s23, 4   ;;  %s4390_s24 = smov %s4028_s25 }
 0x3da   : > { %s4391_s25 = smov %s4032_s26  ;;  %s4392_s26 = smov %s4192_s11 }
 0x3db   : > { %s4393_s27 = smov %s4183_s23  ;;  %24 = sbr.rel (!%p22_p13) target bundleno = 9 (0x9), region = 109 }
 0x3e0   :  { %2826 = vsyncpa [#allocation3], 1 }
 0x3e1   :  { %2828 = vsyncpa [#allocation3 + $0x1], 1 }
 0x3e2   :  { %2829 = vsyncpa [#allocation6], 1 }
 0x3e3   :  { %2830 = vsyncpa [#allocation9], 1 }
 0x3e4   :  { %2831 = vsyncpa [#allocation4], 1 }
 0x3e5   :  { %2833 = vsyncpa [#allocation4 + $0x1], 1 }

</bundles_post_ra>
